<compile_context>
chip_gen: v6e
topology: v6e:2x2x1
jax: 0.10.0
libtpu: 0.0.40
codegen_flags: <defaults>
</compile_context>

<pallas_src>
import functools

import jax
import jax.numpy as jnp
import numpy as np
from jax.experimental import pallas as pl
from jax.experimental.pallas import tpu as pltpu


def _round_up(x, m):
    return (x + m - 1) // m * m


def _vmem_capacity_bytes():
    try:
        return int(pltpu.get_tpu_info().vmem_capacity_bytes)
    except Exception:
        return 64 * 1024 * 1024          # conservative fallback (v7x per-core VMEM)


def _layer_norm(emb, gamma, beta, hidden, eps):
    """f32 LayerNorm over the first `hidden` lanes of a (tn, h_pad) block."""
    tn, h_pad = emb.shape
    inv_h = 1.0 / float(hidden)
    mean = jnp.sum(emb, axis=-1, keepdims=True) * inv_h          # padded lanes are zero
    cen = emb - mean
    if h_pad != hidden:                                          # mask padded lanes for the var
        lane = jax.lax.broadcasted_iota(jnp.int32, (tn, h_pad), 1)
        cen = jnp.where(lane < hidden, cen, 0.0)
    var = jnp.sum(cen * cen, axis=-1, keepdims=True) * inv_h
    return cen * jax.lax.rsqrt(var + eps) * gamma + beta


# --------------------------------------------------------------------------------------
# Path A: word table fully VMEM-resident; grid = (token tiles,)
# --------------------------------------------------------------------------------------
def _resident_kernel(ids_ref, wtab_ref, stab_ref, gamma_ref, beta_ref, out_ref,
                     *, hidden, eps):
    tn = ids_ref.shape[0]
    vw_pad = wtab_ref.shape[0]
    vs_pad = stab_ref.shape[0]
    ids = ids_ref[...]                                           # (tn, 4) int32

    # Word embedding: one-hot (tn, vw_pad) @ (vw_pad, h_pad) on the MXU (selection exact).
    wlanes = jax.lax.broadcasted_iota(jnp.int32, (tn, vw_pad), 1)
    whot = (wlanes == ids[:, 0:1]).astype(wtab_ref.dtype)
    emb = jnp.dot(whot, wtab_ref[...], preferred_element_type=jnp.float32)

    # Seg/age/abspos: disjoint offset ranges of the small resident table -> 3-hot matmul.
    slanes = jax.lax.broadcasted_iota(jnp.int32, (tn, vs_pad), 1)
    shot = ((slanes == ids[:, 1:2]) | (slanes == ids[:, 2:3])
            | (slanes == ids[:, 3:4])).astype(stab_ref.dtype)
    emb = emb + jnp.dot(shot, stab_ref[...], preferred_element_type=jnp.float32)

    # LayerNorm + affine in f32 (v5e has no bf16 VPU); dropout is identity in eval mode.
    out_ref[...] = _layer_norm(emb, gamma_ref[...], beta_ref[...],
                               hidden, eps).astype(out_ref.dtype)


# --------------------------------------------------------------------------------------
# Path B: word table streamed over an "arbitrary" vocab axis; grid = (token tiles, vocab tiles)
# --------------------------------------------------------------------------------------
def _streamed_kernel(ids_ref, wtab_ref, stab_ref, gamma_ref, beta_ref, out_ref,
                     *, hidden, eps):
    v = pl.program_id(1)
    tn = ids_ref.shape[0]
    tvw = wtab_ref.shape[0]
    vs_pad = stab_ref.shape[0]
    ids = ids_ref[...]                                           # (tn, 4) int32

    # Word one-hot for this vocab slab: shift the ids (a (tn,1) subtract), not the big iota.
    wid_local = ids[:, 0:1] - v * tvw
    wlanes = jax.lax.broadcasted_iota(jnp.int32, (tn, tvw), 1)
    whot = (wlanes == wid_local).astype(wtab_ref.dtype)
    contrib = jnp.dot(whot, wtab_ref[...], preferred_element_type=jnp.float32)

    @pl.when(v == 0)
    def _():
        # Seg/age/abspos handled once from the VMEM-resident small table; initializes out_ref.
        slanes = jax.lax.broadcasted_iota(jnp.int32, (tn, vs_pad), 1)
        shot = ((slanes == ids[:, 1:2]) | (slanes == ids[:, 2:3])
                | (slanes == ids[:, 3:4])).astype(stab_ref.dtype)
        out_ref[...] = contrib + jnp.dot(shot, stab_ref[...],
                                         preferred_element_type=jnp.float32)

    @pl.when(v != 0)
    def _():
        out_ref[...] = out_ref[...] + contrib                    # f32 output block = accumulator

    @pl.when(v == pl.num_programs(1) - 1)
    def _():
        out_ref[...] = _layer_norm(out_ref[...], gamma_ref[...], beta_ref[...],
                                   hidden, eps).astype(out_ref.dtype)


# --------------------------------------------------------------------------------------
# Host-side param packing (hoisted out of the per-forward path: run once per weight update)
# --------------------------------------------------------------------------------------
def prepare_params(word_w, seg_w, age_w, abspos_w, gamma, beta, *,
                   table_dtype=jnp.bfloat16, word_block=2048):
    vw, H = word_w.shape
    vs, va, vp = seg_w.shape[0], age_w.shape[0], abspos_w.shape[0]
    h_pad = _round_up(H, 128)                                    # lane-dense output / tables

    wb = _round_up(min(word_block, _round_up(vw, 128)), 128)     # word-vocab tile for streaming
    vw_pad = _round_up(vw, wb)
    word_tab = jnp.pad(word_w, ((0, vw_pad - vw), (0, h_pad - H))).astype(table_dtype)

    vsm = vs + va + vp
    vsm_pad = _round_up(vsm, 128)
    small = jnp.concatenate([seg_w, age_w, abspos_w], axis=0)
    small_tab = jnp.pad(small, ((0, vsm_pad - vsm), (0, h_pad - H))).astype(table_dtype)

    gamma_p = jnp.pad(gamma.astype(jnp.float32).reshape(-1), (0, h_pad - H)).reshape(1, h_pad)
    beta_p = jnp.pad(beta.astype(jnp.float32).reshape(-1), (0, h_pad - H)).reshape(1, h_pad)

    return dict(word_tab=word_tab, small_tab=small_tab, gamma=gamma_p, beta=beta_p,
                hidden=H, word_block=wb, seg_rows=vs, age_rows=va)


def discrete_abspos_embeddings(input_ids, token_type_ids, age_ids, abspos_ids, params,
                               *, tn=1024, eps=1e-12, resident=None):
    B, S = input_ids.shape
    N = B * S
    word_tab, small_tab = params["word_tab"], params["small_tab"]
    gamma_p, beta_p = params["gamma"], params["beta"]
    H = params["hidden"]
    vw_pad, h_pad = word_tab.shape
    vsm_pad = small_tab.shape[0]
    tvw = params["word_block"]
    itm = word_tab.dtype.itemsize

    # Token tile: multiple of 256 keeps the 256x256 MXU M dim full (v6e/v7x); small N is padded
    # up to 256 rather than shrinking the tile.  N >= 2*tn gives >=2 "parallel" tiles for v7x's
    # two TensorCores.
    tn = _round_up(max(256, min(int(tn), _round_up(N, 256))), 256)

    budget = int(0.75 * _vmem_capacity_bytes())                  # ≈96 MiB v5e/v6e, ≈48 MiB v7x
    margin = 2 << 20

    def io_bytes(t):                                             # ids + out (double-buffered) + gamma/beta
        return 2 * t * 4 * 4 + 2 * t * h_pad * 4 + 4 * h_pad * 4

    def resident_need(t):
        # Tables counted x2 (pipeline may double-buffer constant blocks) + one-hot working set.
        return (2 * (vw_pad + vsm_pad) * h_pad * itm + io_bytes(t)
                + t * (vw_pad + vsm_pad) * 8 + t * h_pad * 4)

    def streamed_need(t):
        return (2 * tvw * h_pad * itm + 2 * vsm_pad * h_pad * itm + io_bytes(t)
                + t * (tvw + vsm_pad) * 8 + t * h_pad * 4)

    if resident is None:
        t = tn
        while t > 256 and resident_need(t) > budget - margin:
            t -= 256
        resident = resident_need(t) <= budget - margin
        if resident:
            tn = t
    if not resident:
        while tn > 256 and streamed_need(tn) > budget - margin:
            tn -= 256

    n_pad = _round_up(N, tn)

    # Offset seg/age/abspos ids into the concatenated small table; pad rows with -1 (never
    # matches -> zero row -> LayerNorm emits beta; sliced away below).
    ids4 = jnp.stack(
        [input_ids.reshape(-1),
         token_type_ids.reshape(-1),
         age_ids.reshape(-1) + params["seg_rows"],
         abspos_ids.reshape(-1) + params["seg_rows"] + params["age_rows"]],
        axis=-1).astype(jnp.int32)
    ids4 = jnp.pad(ids4, ((0, n_pad - N), (0, 0)), constant_values=-1)

    out_shape = jax.ShapeDtypeStruct((n_pad, h_pad), jnp.float32)

    if resident:
        grid = (n_pad // tn,)
        out = pl.pallas_call(
            functools.partial(_resident_kernel, hidden=H, eps=eps),
            out_shape=out_shape,
            grid_spec=pltpu.PrefetchScalarGridSpec(
                num_scalar_prefetch=0,
                grid=grid,
                in_specs=[
                    pl.BlockSpec((tn, 4), lambda t: (t, 0)),            # ids (pipelined)
                    pl.BlockSpec((vw_pad, h_pad), lambda t: (0, 0)),    # word table (resident)
                    pl.BlockSpec((vsm_pad, h_pad), lambda t: (0, 0)),   # seg/age/abspos table
                    pl.BlockSpec((1, h_pad), lambda t: (0, 0)),         # gamma
                    pl.BlockSpec((1, h_pad), lambda t: (0, 0)),         # beta
                ],
                out_specs=pl.BlockSpec((tn, h_pad), lambda t: (t, 0)),
            ),
            compiler_params=pltpu.CompilerParams(
                dimension_semantics=("parallel",),
                vmem_limit_bytes=budget),
        )(ids4, word_tab, small_tab, gamma_p, beta_p)
    else:
        grid = (n_pad // tn, vw_pad // tvw)
        out = pl.pallas_call(
            functools.partial(_streamed_kernel, hidden=H, eps=eps),
            out_shape=out_shape,
            grid_spec=pltpu.PrefetchScalarGridSpec(
                num_scalar_prefetch=0,
                grid=grid,
                in_specs=[
                    pl.BlockSpec((tn, 4), lambda t, v: (t, 0)),          # ids
                    pl.BlockSpec((tvw, h_pad), lambda t, v: (v, 0)),     # word table slab (streamed)
                    pl.BlockSpec((vsm_pad, h_pad), lambda t, v: (0, 0)), # small table (resident)
                    pl.BlockSpec((1, h_pad), lambda t, v: (0, 0)),       # gamma
                    pl.BlockSpec((1, h_pad), lambda t, v: (0, 0)),       # beta
                ],
                out_specs=pl.BlockSpec((tn, h_pad), lambda t, v: (t, 0)),
            ),
            compiler_params=pltpu.CompilerParams(
                dimension_semantics=("parallel", "arbitrary"),
                vmem_limit_bytes=budget),
        )(ids4, word_tab, small_tab, gamma_p, beta_p)

    return out[:N, :H].reshape(B, S, H)


def _reference(input_ids, token_type_ids, age_ids, abspos_ids,
               word_w, seg_w, age_w, abspos_w, gamma, beta, eps=1e-12):
    emb = (jnp.take(word_w, input_ids, axis=0)
           + jnp.take(age_w, age_ids, axis=0)
           + jnp.take(abspos_w, abspos_ids, axis=0)
           + jnp.take(seg_w, token_type_ids, axis=0))
    mean = jnp.mean(emb, axis=-1, keepdims=True)
    var = jnp.mean((emb - mean) ** 2, axis=-1, keepdims=True)
    return (emb - mean) * jax.lax.rsqrt(var + eps) * gamma + beta


if __name__ == "__main__":
    # ---- Config 1: small module-consistent shapes; exercises the resident path. ----
    B, S, H = 2, 8, 32
    vocab_size, max_segment, age_vocab, type_vocab = 64, 4, 16, 32
    k = jax.random.split(jax.random.PRNGKey(0), 8)
    word_w = 0.02 * jax.random.normal(k[0], (vocab_size, H), jnp.float32)
    seg_w = 0.02 * jax.random.normal(k[1], (max_segment, H), jnp.float32)
    age_w = 0.02 * jax.random.normal(k[2], (age_vocab, H), jnp.float32)
    abspos_w = 0.02 * jax.random.normal(k[3], (type_vocab, H), jnp.float32)
    gamma = jnp.ones((H,), jnp.float32)
    beta = jnp.zeros((H,), jnp.float32)
    input_ids = jax.random.randint(k[4], (B, S), 0, vocab_size, jnp.int32)
    token_type_ids = jax.random.randint(k[5], (B, S), 0, max_segment, jnp.int32)
    age_ids = jax.random.randint(k[6], (B, S), 0, age_vocab, jnp.int32)
    abspos_ids = jax.random.randint(k[7], (B, S), 0, type_vocab, jnp.int32)

    ref = _reference(input_ids, token_type_ids, age_ids, abspos_ids,
                     word_w, seg_w, age_w, abspos_w, gamma, beta)

    # f32 tables: bit-faithful verification path (resident).
    params_f32 = prepare_params(word_w, seg_w, age_w, abspos_w, gamma, beta,
                                table_dtype=jnp.float32)
    out_f32 = jax.block_until_ready(discrete_abspos_embeddings(
        input_ids, token_type_ids, age_ids, abspos_ids, params_f32))
    assert out_f32.shape == (B, S, H)
    assert np.allclose(np.asarray(out_f32), np.asarray(ref), atol=1e-4, rtol=1e-4)

    # Default bf16-table MXU fast path (resident) vs a bf16-quantized-table reference.
    params_bf16 = prepare_params(word_w, seg_w, age_w, abspos_w, gamma, beta)
    out_bf16 = jax.block_until_ready(discrete_abspos_embeddings(
        input_ids, token_type_ids, age_ids, abspos_ids, params_bf16))
    q = lambda w: w.astype(jnp.bfloat16).astype(jnp.float32)
    ref_bf16 = _reference(input_ids, token_type_ids, age_ids, abspos_ids,
                          q(word_w), q(seg_w), q(age_w), q(abspos_w), gamma, beta)
    assert out_bf16.shape == (B, S, H)
    assert np.allclose(np.asarray(out_bf16), np.asarray(ref_bf16), atol=2e-3, rtol=2e-3)

    # ---- Config 2: force the streamed path with >1 token tile and >1 word-vocab slab. ----
    B2, S2, H2 = 2, 192, 32
    vocab2, seg2, age2, abs2 = 300, 6, 20, 50
    k2 = jax.random.split(jax.random.PRNGKey(1), 8)
    word_w2 = 0.02 * jax.random.normal(k2[0], (vocab2, H2), jnp.float32)
    seg_w2 = 0.02 * jax.random.normal(k2[1], (seg2, H2), jnp.float32)
    age_w2 = 0.02 * jax.random.normal(k2[2], (age2, H2), jnp.float32)
    abspos_w2 = 0.02 * jax.random.normal(k2[3], (abs2, H2), jnp.float32)
    gamma2 = 1.0 + 0.1 * jax.random.normal(k2[4], (H2,), jnp.float32)
    beta2 = 0.1 * jax.random.normal(k2[5], (H2,), jnp.float32)
    in2 = jax.random.randint(k2[6], (B2, S2), 0, vocab2, jnp.int32)
    tt2 = jax.random.randint(k2[7], (B2, S2), 0, seg2, jnp.int32)
    ag2 = jax.random.randint(jax.random.PRNGKey(2), (B2, S2), 0, age2, jnp.int32)
    ab2 = jax.random.randint(jax.random.PRNGKey(3), (B2, S2), 0, abs2, jnp.int32)

    params2 = prepare_params(word_w2, seg_w2, age_w2, abspos_w2, gamma2, beta2,
                             table_dtype=jnp.float32, word_block=128)
    out2 = jax.block_until_ready(discrete_abspos_embeddings(
        in2, tt2, ag2, ab2, params2, tn=256, resident=False))
    ref2 = _reference(in2, tt2, ag2, ab2,
                      word_w2, seg_w2, age_w2, abspos_w2, gamma2, beta2)
    assert out2.shape == (B2, S2, H2)
    assert np.allclose(np.asarray(out2), np.asarray(ref2), atol=1e-4, rtol=1e-4)

    print("KERNEL_OK")
</pallas_src>

<mosaic_0001>
module attributes {stable_mosaic.version = 11 : i64} {
  func.func @_resident_kernel(%arg0: i32, %arg1: memref<256x4xi32, #tpu.memory_space<vmem>>, %arg2: memref<128x128xf32, #tpu.memory_space<vmem>>, %arg3: memref<128x128xf32, #tpu.memory_space<vmem>>, %arg4: memref<1x128xf32, #tpu.memory_space<vmem>>, %arg5: memref<1x128xf32, #tpu.memory_space<vmem>>, %arg6: memref<256x128xf32, #tpu.memory_space<vmem>>) attributes {dimension_semantics = [#tpu.dimension_semantics<parallel>], iteration_bounds = array<i64: 1>, scalar_prefetch = 0 : i64, scratch_operands = 0 : i64, tpu.core_type = #tpu.core_type<tc>, window_params = [{transform_indices = @transform_0, window_bounds = array<i64: 256, 4>}, {pipeline_mode = #tpu.pipeline_mode<synchronous>, transform_indices = @transform_1, window_bounds = array<i64: 128, 128>}, {pipeline_mode = #tpu.pipeline_mode<synchronous>, transform_indices = @transform_2, window_bounds = array<i64: 128, 128>}, {pipeline_mode = #tpu.pipeline_mode<synchronous>, transform_indices = @transform_3, window_bounds = array<i64: 1, 128>}, {pipeline_mode = #tpu.pipeline_mode<synchronous>, transform_indices = @transform_4, window_bounds = array<i64: 1, 128>}, {transform_indices = @transform_5, window_bounds = array<i64: 256, 128>}]} {
    %c0 = arith.constant 0 : index
    %c0_0 = arith.constant 0 : index
    %0 = vector.load %arg1[%c0, %c0_0] : memref<256x4xi32, #tpu.memory_space<vmem>>, vector<256x4xi32>
    %1 = tpu.iota {dimensions = array<i32: 1>} : vector<256x128xi32>
    %2 = vector.extract_strided_slice %0 {offsets = [0, 0], sizes = [256, 1], strides = [1, 1]} : vector<256x4xi32> to vector<256x1xi32>
    %3 = vector.broadcast %2 : vector<256x1xi32> to vector<256x128xi32>
    %4 = arith.cmpi eq, %1, %3 : vector<256x128xi32>
    %5 = arith.extui %4 : vector<256x128xi1> to vector<256x128xi32>
    %6 = arith.sitofp %5 : vector<256x128xi32> to vector<256x128xf32>
    %c0_1 = arith.constant 0 : index
    %c0_2 = arith.constant 0 : index
    %7 = vector.load %arg2[%c0_1, %c0_2] : memref<128x128xf32, #tpu.memory_space<vmem>>, vector<128x128xf32>
    %cst = arith.constant dense<0.000000e+00> : vector<256x128xf32>
    %8 = tpu.matmul %6, %7, %cst {dimension_numbers = #tpu.dot_dimension_numbers<[1], [0], [0], [1], [0, 0, 1, 1], [], []>} : vector<256x128xf32>, vector<128x128xf32>, vector<256x128xf32> -> vector<256x128xf32>
    %9 = tpu.iota {dimensions = array<i32: 1>} : vector<256x128xi32>
    %10 = vector.extract_strided_slice %0 {offsets = [0, 1], sizes = [256, 1], strides = [1, 1]} : vector<256x4xi32> to vector<256x1xi32>
    %11 = vector.broadcast %10 : vector<256x1xi32> to vector<256x128xi32>
    %12 = arith.cmpi eq, %9, %11 : vector<256x128xi32>
    %13 = vector.extract_strided_slice %0 {offsets = [0, 2], sizes = [256, 1], strides = [1, 1]} : vector<256x4xi32> to vector<256x1xi32>
    %14 = vector.broadcast %13 : vector<256x1xi32> to vector<256x128xi32>
    %15 = arith.cmpi eq, %9, %14 : vector<256x128xi32>
    %16 = arith.ori %12, %15 : vector<256x128xi1>
    %17 = vector.extract_strided_slice %0 {offsets = [0, 3], sizes = [256, 1], strides = [1, 1]} : vector<256x4xi32> to vector<256x1xi32>
    %18 = vector.broadcast %17 : vector<256x1xi32> to vector<256x128xi32>
    %19 = arith.cmpi eq, %9, %18 : vector<256x128xi32>
    %20 = arith.ori %16, %19 : vector<256x128xi1>
    %21 = arith.extui %20 : vector<256x128xi1> to vector<256x128xi32>
    %22 = arith.sitofp %21 : vector<256x128xi32> to vector<256x128xf32>
    %c0_3 = arith.constant 0 : index
    %c0_4 = arith.constant 0 : index
    %23 = vector.load %arg3[%c0_3, %c0_4] : memref<128x128xf32, #tpu.memory_space<vmem>>, vector<128x128xf32>
    %cst_5 = arith.constant dense<0.000000e+00> : vector<256x128xf32>
    %24 = tpu.matmul %22, %23, %cst_5 {dimension_numbers = #tpu.dot_dimension_numbers<[1], [0], [0], [1], [0, 0, 1, 1], [], []>} : vector<256x128xf32>, vector<128x128xf32>, vector<256x128xf32> -> vector<256x128xf32>
    %25 = arith.addf %8, %24 : vector<256x128xf32>
    %c0_6 = arith.constant 0 : index
    %c0_7 = arith.constant 0 : index
    %26 = vector.load %arg4[%c0_6, %c0_7] : memref<1x128xf32, #tpu.memory_space<vmem>>, vector<1x128xf32>
    %c0_8 = arith.constant 0 : index
    %c0_9 = arith.constant 0 : index
    %27 = vector.load %arg5[%c0_8, %c0_9] : memref<1x128xf32, #tpu.memory_space<vmem>>, vector<1x128xf32>
    %cst_10 = arith.constant dense<0.000000e+00> : vector<256xf32>
    %28 = vector.multi_reduction <add>, %25, %cst_10 [1] : vector<256x128xf32> to vector<256xf32>
    %29 = vector.shape_cast %28 : vector<256xf32> to vector<256x1xf32>
    %cst_11 = arith.constant 3.125000e-02 : f32
    %30 = vector.broadcast %cst_11 : f32 to vector<256x1xf32>
    %31 = arith.mulf %29, %30 : vector<256x1xf32>
    %32 = vector.broadcast %31 : vector<256x1xf32> to vector<256x128xf32>
    %33 = arith.subf %25, %32 : vector<256x128xf32>
    %34 = tpu.iota {dimensions = array<i32: 1>} : vector<256x128xi32>
    %c32_i32 = arith.constant 32 : i32
    %35 = vector.broadcast %c32_i32 : i32 to vector<256x128xi32>
    %36 = arith.cmpi slt, %34, %35 : vector<256x128xi32>
    %cst_12 = arith.constant 0.000000e+00 : f32
    %37 = vector.broadcast %cst_12 : f32 to vector<256x128xf32>
    %38 = arith.select %36, %33, %37 : vector<256x128xi1>, vector<256x128xf32>
    %39 = arith.mulf %38, %38 : vector<256x128xf32>
    %cst_13 = arith.constant dense<0.000000e+00> : vector<256xf32>
    %40 = vector.multi_reduction <add>, %39, %cst_13 [1] : vector<256x128xf32> to vector<256xf32>
    %41 = vector.shape_cast %40 : vector<256xf32> to vector<256x1xf32>
    %cst_14 = arith.constant 3.125000e-02 : f32
    %42 = vector.broadcast %cst_14 : f32 to vector<256x1xf32>
    %43 = arith.mulf %41, %42 : vector<256x1xf32>
    %cst_15 = arith.constant 9.99999996E-13 : f32
    %44 = vector.broadcast %cst_15 : f32 to vector<256x1xf32>
    %45 = arith.addf %43, %44 : vector<256x1xf32>
    %46 = math.rsqrt %45 : vector<256x1xf32>
    %47 = vector.broadcast %46 : vector<256x1xf32> to vector<256x128xf32>
    %48 = arith.mulf %38, %47 : vector<256x128xf32>
    %49 = vector.broadcast %26 : vector<1x128xf32> to vector<256x128xf32>
    %50 = arith.mulf %48, %49 : vector<256x128xf32>
    %51 = vector.broadcast %27 : vector<1x128xf32> to vector<256x128xf32>
    %52 = arith.addf %50, %51 : vector<256x128xf32>
    %c0_16 = arith.constant 0 : index
    %c0_17 = arith.constant 0 : index
    %53 = vector.load %arg6[%c0_16, %c0_17] : memref<256x128xf32, #tpu.memory_space<vmem>>, vector<256x128xf32>
    tpu.vector_store %arg6[%c0_16, %c0_17], %52 {strides = array<i32>} : memref<256x128xf32, #tpu.memory_space<vmem>>, vector<256x128xf32>,
    return
  }
  func.func @transform_0(%arg0: i32) -> (i32, i32) {
    %c0_i32 = arith.constant 0 : i32
    %c0_i32_0 = arith.constant 0 : i32
    return %arg0, %c0_i32 : i32, i32
  }
  func.func @transform_1(%arg0: i32) -> (i32, i32) {
    %c0_i32 = arith.constant 0 : i32
    %c0_i32_0 = arith.constant 0 : i32
    %c0_i32_1 = arith.constant 0 : i32
    return %c0_i32, %c0_i32_0 : i32, i32
  }
  func.func @transform_2(%arg0: i32) -> (i32, i32) {
    %c0_i32 = arith.constant 0 : i32
    %c0_i32_0 = arith.constant 0 : i32
    %c0_i32_1 = arith.constant 0 : i32
    return %c0_i32, %c0_i32_0 : i32, i32
  }
  func.func @transform_3(%arg0: i32) -> (i32, i32) {
    %c0_i32 = arith.constant 0 : i32
    %c0_i32_0 = arith.constant 0 : i32
    %c0_i32_1 = arith.constant 0 : i32
    return %c0_i32, %c0_i32_0 : i32, i32
  }
  func.func @transform_4(%arg0: i32) -> (i32, i32) {
    %c0_i32 = arith.constant 0 : i32
    %c0_i32_0 = arith.constant 0 : i32
    %c0_i32_1 = arith.constant 0 : i32
    return %c0_i32, %c0_i32_0 : i32, i32
  }
  func.func @transform_5(%arg0: i32) -> (i32, i32) {
    %c0_i32 = arith.constant 0 : i32
    %c0_i32_0 = arith.constant 0 : i32
    return %arg0, %c0_i32 : i32, i32
  }
}

</mosaic_0001>

<bundles_post_ra>
// kernel: tpu_custom_call.1
= control target key start
LH: loop header
LB: loop body
LE: loop exit
PB: predicated region body
PF: predicated region fallthrough
CT: control target
= control target key end

     0   :  { %v2283_v2 = vmov 0   ;;  %s3429_s0 = inlined_call_operand.vmem [shape: s32[256,4], index: 0, kind: input, shape index: {}]   ;;  %s3430_s1 = inlined_call_operand.vmem [shape: f32[128,128], index: 1, kind: input, shape index: {}]   ;;  %s3431_s2 = inlined_call_operand.vmem [shape: f32[128,128], index: 2, kind: input, shape index: {}]   ;;  %s3432_s3 = inlined_call_operand.vmem [shape: f32[1,128], index: 3, kind: input, shape index: {}]   ;;  %s3433_s4 = inlined_call_operand.vmem [shape: f32[1,128], index: 4, kind: input, shape index: {}]   ;;  %s3434_s5 = inlined_call_operand.hbm [shape: f32[256,128], index: 5, kind: output, shape index: {}]  }
   0x1   :  { %v2324_v0 = vld [vmem:[%s3429_s0 + $0x10] sm:$0xff]  ;;  %v2329_v1 = vld [vmem:[%s3429_s0] sm:$0xff]  ;;  %2147 = vset.pattern.permute.xlu1 %v2283_v2  ;;  %2146 = vset.pattern.permute.xlu0 %v2283_v2  ;;  %v2336_v3 = vld [vmem:[%s3429_s0 + $0x18] sm:$0xff] }
   0x2   :  { %62 = vperm.xlu1 %2147, %v2324_v0   ;;  %56 = vperm.xlu0 %2146, %v2329_v1   ;;  %v2341_v4 = vld [vmem:[%s3429_s0 + $0x8] sm:$0xff]  ;;  %v2353_v6 = vld [vmem:[%s3429_s0 + $0x20] sm:$0xff]  ;;  %v262_v7 = vld [vmem:[%s3430_s1 + $0x78] sm:$0xff] }
   0x3   :  { %v2348_v5 = vld [vmem:[%s3429_s0 + $0x28] sm:$0xff]  ;;  %v2363_v8 = vld [vmem:[%s3429_s0 + $0x38] sm:$0xff]  ;;  %v2368_v9 = vld [vmem:[%s3429_s0 + $0x30] sm:$0xff]  ;;  %2058 = vmatprep.subr.mxu1 %v262_v7 }
   0x4   :  { %v261_v10 = vld [vmem:[%s3430_s1 + $0x70] sm:$0xff]  ;;  %2059 = vmatpush3.msra.mxu1 %v262_v7  ;;  %v260_v11 = vld [vmem:[%s3430_s1 + $0x68] sm:$0xff]  ;;  %v2386_v13 = vld [vmem:[%s3429_s0 + $0x40] sm:$0xff] }
   0x5   :  { %2060 = vmatprep.subr.mxu1 %v261_v10  ;;  %v2381_v12 = vld [vmem:[%s3429_s0 + $0x48] sm:$0xff]  ;;  %v259_v14 = vld [vmem:[%s3430_s1 + $0x60] sm:$0xff] }
   0x6   :  { %65 = vperm.xlu1 %2147, %v2336_v3   ;;  %59 = vperm.xlu0 %2146, %v2341_v4  }
   0x7   :  { %2061 = vmatpush3.msra.mxu1 %v261_v10 }
   0x8   :  { %2062 = vmatprep.subr.mxu1 %v260_v11 }
   0xa   :  { %71 = vperm.xlu1 %2147, %v2348_v5   ;;  %68 = vperm.xlu0 %2146, %v2353_v6  }
   0xe   :  { %77 = vperm.xlu1 %2147, %v2363_v8   ;;  %74 = vperm.xlu0 %2146, %v2368_v9  }
   0xf   :  { %10 = vsyncpa [#allocation3], 0  ;;  %2063 = vmatpush3.msra.mxu1 %v260_v11  ;;  %v258_v15 = vld [vmem:[%s3430_s1 + $0x58] sm:$0xff]  ;;  %v2404_v17 = vld [vmem:[%s3429_s0 + $0x50] sm:$0xff]  ;;  %v2284_v53 = vmov 1   ;;  %v2285_v60 = vmov 2  }
  0x10   :  { %v2399_v16 = vld [vmem:[%s3429_s0 + $0x58] sm:$0xff]  ;;  %2064 = vmatprep.subr.mxu1 %v259_v14  ;;  %v257_v18 = vld [vmem:[%s3430_s1 + $0x50] sm:$0xff]  ;;  %v2414_v19 = vld [vmem:[%s3429_s0 + $0x68] sm:$0xff]  ;;  %v2286_v61 = vmov 3  }
  0x11   :  { %2065 = vmatpush3.msra.mxu1 %v259_v14  ;;  %v2419_v20 = vld [vmem:[%s3429_s0 + $0x60] sm:$0xff]  ;;  %v256_v21 = vld [vmem:[%s3430_s1 + $0x48] sm:$0xff]  ;;  %v2432_v23 = vld [vmem:[%s3429_s0 + $0x78] sm:$0xff] }
  0x12   :  { %83 = vperm.xlu1 %2147, %v2381_v12   ;;  %80 = vperm.xlu0 %2146, %v2386_v13   ;;  %v255_v22 = vld [vmem:[%s3430_s1 + $0x40] sm:$0xff]  ;;  %v2437_v24 = vld [vmem:[%s3429_s0 + $0x70] sm:$0xff]  ;;  %v254_v25 = vld [vmem:[%s3430_s1 + $0x38] sm:$0xff] }
  0x13   :  { %2066 = vmatprep.subr.mxu1 %v258_v15  ;;  %v2447_v26 = vld [vmem:[%s3429_s0 + $0x88] sm:$0xff]  ;;  %v2452_v27 = vld [vmem:[%s3429_s0 + $0x80] sm:$0xff]  ;;  %v253_v28 = vld [vmem:[%s3430_s1 + $0x30] sm:$0xff] }
  0x14   :  { %2067 = vmatpush3.msra.mxu1 %v258_v15  ;;  %v252_v29 = vld [vmem:[%s3430_s1 + $0x28] sm:$0xff]  ;;  %v2465_v30 = vld [vmem:[%s3429_s0 + $0x98] sm:$0xff]  ;;  %v2470_v31 = vld [vmem:[%s3429_s0 + $0x90] sm:$0xff] }
  0x15   :  { %2068 = vmatprep.subr.mxu1 %v257_v18  ;;  %v251_v32 = vld [vmem:[%s3430_s1 + $0x20] sm:$0xff]  ;;  %v2480_v33 = vld [vmem:[%s3429_s0 + $0xa8] sm:$0xff]  ;;  %v250_v35 = vld [vmem:[%s3430_s1 + $0x18] sm:$0xff] }
  0x16   :  { %89 = vperm.xlu1 %2147, %v2399_v16   ;;  %86 = vperm.xlu0 %2146, %v2404_v17   ;;  %v2485_v34 = vld [vmem:[%s3429_s0 + $0xa0] sm:$0xff]  ;;  %v249_v36 = vld [vmem:[%s3430_s1 + $0x10] sm:$0xff]  ;;  %v2498_v37 = vld [vmem:[%s3429_s0 + $0xb8] sm:$0xff] }
  0x17   :  { %2069 = vmatpush3.msra.mxu1 %v257_v18  ;;  %v2503_v38 = vld [vmem:[%s3429_s0 + $0xb0] sm:$0xff]  ;;  %v248_v39 = vld [vmem:[%s3430_s1 + $0x8] sm:$0xff]  ;;  %v2518_v41 = vld [vmem:[%s3429_s0 + $0xc0] sm:$0xff] }
  0x18   :  { %2070 = vmatprep.subr.mxu1 %v256_v21  ;;  %v2513_v40 = vld [vmem:[%s3429_s0 + $0xc8] sm:$0xff]  ;;  %v247_v42 = vld [vmem:[%s3430_s1] sm:$0xff]  ;;  %v2528_v43 = vld [vmem:[%s3429_s0 + $0xd8] sm:$0xff] }
  0x19   :  { %2071 = vmatpush3.msra.mxu1 %v256_v21  ;;  %v2533_v44 = vld [vmem:[%s3429_s0 + $0xd0] sm:$0xff]  ;;  %v2540_v45 = vld [vmem:[%s3429_s0 + $0xe8] sm:$0xff]  ;;  %v2545_v46 = vld [vmem:[%s3429_s0 + $0xe0] sm:$0xff] }
  0x1a   :  { %95 = vperm.xlu1 %2147, %v2414_v19   ;;  %92 = vperm.xlu0 %2146, %v2419_v20   ;;  %v790_v47 = vld [vmem:[%s3431_s2 + $0x78] sm:$0xff]  ;;  %v2560_v49 = vld [vmem:[%s3429_s0 + $0xf0] sm:$0xff]  ;;  %v788_v51 = vld [vmem:[%s3431_s2 + $0x68] sm:$0xff] }
  0x1b   :  { %2072 = vmatprep.subr.mxu1 %v255_v22  ;;  %v2555_v48 = vld [vmem:[%s3429_s0 + $0xf8] sm:$0xff]  ;;  %1978 = vmatprep.subr.mxu0 %v790_v47  ;;  %v789_v50 = vld [vmem:[%s3431_s2 + $0x70] sm:$0xff]  ;;  %v787_v52 = vld [vmem:[%s3431_s2 + $0x60] sm:$0xff] }
  0x1c   :  { %2073 = vmatpush3.msra.mxu1 %v255_v22  ;;  %1979 = vmatpush3.msra.mxu0 %v790_v47  ;;  %v786_v54 = vld [vmem:[%s3431_s2 + $0x58] sm:$0xff]  ;;  %v785_v55 = vld [vmem:[%s3431_s2 + $0x50] sm:$0xff]  ;;  %v784_v56 = vld [vmem:[%s3431_s2 + $0x48] sm:$0xff] }
  0x1d   :  { %2074 = vmatprep.subr.mxu1 %v254_v25  ;;  %1980 = vmatprep.subr.mxu0 %v789_v50  ;;  %v783_v57 = vld [vmem:[%s3431_s2 + $0x40] sm:$0xff]  ;;  %v782_v58 = vld [vmem:[%s3431_s2 + $0x38] sm:$0xff]  ;;  %v781_v59 = vld [vmem:[%s3431_s2 + $0x30] sm:$0xff] }
  0x1e   :  { %101 = vperm.xlu1 %2147, %v2432_v23   ;;  %98 = vperm.xlu0 %2146, %v2437_v24   ;;  %v780_v62 = vld [vmem:[%s3431_s2 + $0x28] sm:$0xff]  ;;  %v779_v63 = vld [vmem:[%s3431_s2 + $0x20] sm:$0xff]  ;;  %v778_v2 = vld [vmem:[%s3431_s2 + $0x18] sm:$0xff] }
  0x1f   :  { %2075 = vmatpush3.msra.mxu1 %v254_v25  ;;  %1981 = vmatpush3.msra.mxu0 %v789_v50  ;;  %v777_v7 = vld [vmem:[%s3431_s2 + $0x10] sm:$0xff] }
  0x20   :  { %2076 = vmatprep.subr.mxu1 %v253_v28  ;;  %1982 = vmatprep.subr.mxu0 %v788_v51 }
  0x21   :  { %2077 = vmatpush3.msra.mxu1 %v253_v28  ;;  %1983 = vmatpush3.msra.mxu0 %v788_v51 }
  0x22   :  { %107 = vperm.xlu1 %2147, %v2447_v26   ;;  %104 = vperm.xlu0 %2146, %v2452_v27  }
  0x23   :  { %2078 = vmatprep.subr.mxu1 %v252_v29  ;;  %1984 = vmatprep.subr.mxu0 %v787_v52 }
  0x24   :  { %2079 = vmatpush3.msra.mxu1 %v252_v29  ;;  %1985 = vmatpush3.msra.mxu0 %v787_v52 }
  0x25   :  { %2080 = vmatprep.subr.mxu1 %v251_v32  ;;  %1986 = vmatprep.subr.mxu0 %v786_v54 }
  0x26   :  { %113 = vperm.xlu1 %2147, %v2465_v30   ;;  %110 = vperm.xlu0 %2146, %v2470_v31  }
  0x27   :  { %2081 = vmatpush3.msra.mxu1 %v251_v32  ;;  %1987 = vmatpush3.msra.mxu0 %v786_v54 }
  0x28   :  { %2082 = vmatprep.subr.mxu1 %v250_v35  ;;  %1988 = vmatprep.subr.mxu0 %v785_v55 }
  0x29   :  { %2083 = vmatpush3.msra.mxu1 %v250_v35  ;;  %1989 = vmatpush3.msra.mxu0 %v785_v55 }
  0x2a   :  { %119 = vperm.xlu1 %2147, %v2480_v33   ;;  %116 = vperm.xlu0 %2146, %v2485_v34  }
  0x2b   :  { %2084 = vmatprep.subr.mxu1 %v249_v36  ;;  %1990 = vmatprep.subr.mxu0 %v784_v56 }
  0x2c   :  { %2085 = vmatpush3.msra.mxu1 %v249_v36  ;;  %1991 = vmatpush3.msra.mxu0 %v784_v56 }
  0x2d   :  { %2086 = vmatprep.subr.mxu1 %v248_v39  ;;  %1992 = vmatprep.subr.mxu0 %v783_v57 }
  0x2e   :  { %125 = vperm.xlu1 %2147, %v2498_v37   ;;  %122 = vperm.xlu0 %2146, %v2503_v38  }
  0x2f   :  { %2087 = vmatpush3.msra.mxu1 %v248_v39  ;;  %1993 = vmatpush3.msra.mxu0 %v783_v57 }
  0x30   :  { %2088 = vmatprep.subr.mxu1 %v247_v42  ;;  %1994 = vmatprep.subr.mxu0 %v782_v58 }
  0x31   :  { %2089 = vmatpush3.msra.mxu1 %v247_v42  ;;  %1995 = vmatpush3.msra.mxu0 %v782_v58 }
  0x32   :  { %131 = vperm.xlu1 %2147, %v2513_v40   ;;  %128 = vperm.xlu0 %2146, %v2518_v41  }
  0x33   :  { %1996 = vmatprep.subr.mxu0 %v781_v59 }
  0x34   :  { %1997 = vmatpush3.msra.mxu0 %v781_v59 }
  0x35   :  { %1998 = vmatprep.subr.mxu0 %v780_v62 }
  0x36   :  { %137 = vperm.xlu1 %2147, %v2528_v43   ;;  %134 = vperm.xlu0 %2146, %v2533_v44  }
  0x37   :  { %1999 = vmatpush3.msra.mxu0 %v780_v62 }
  0x38   :  { %2000 = vmatprep.subr.mxu0 %v779_v63 }
  0x39   :  { %2001 = vmatpush3.msra.mxu0 %v779_v63 }
  0x3a   :  { %143 = vperm.xlu1 %2147, %v2540_v45   ;;  %140 = vperm.xlu0 %2146, %v2545_v46  }
  0x3b   :  { %2002 = vmatprep.subr.mxu0 %v778_v2 }
  0x3c   :  { %2003 = vmatpush3.msra.mxu0 %v778_v2 }
  0x3d   :  { %2004 = vmatprep.subr.mxu0 %v777_v7 }
  0x3e   :  { %149 = vperm.xlu1 %2147, %v2555_v48   ;;  %146 = vperm.xlu0 %2146, %v2560_v49  }
  0x3f   :  { %2005 = vmatpush3.msra.mxu0 %v777_v7 }
  0x42   :  { %2149 = vset.pattern.permute.xlu1 %v2284_v53  ;;  %2148 = vset.pattern.permute.xlu0 %v2284_v53 }
  0x43   :  { %267 = vperm.xlu1 %2149, %v2341_v4   ;;  %264 = vperm.xlu0 %2148, %v2329_v1  }
  0x47   :  { %270 = vperm.xlu1 %2149, %v2324_v0   ;;  %273 = vperm.xlu0 %2148, %v2336_v3  }
  0x4b   :  { %276 = vperm.xlu1 %2149, %v2353_v6   ;;  %279 = vperm.xlu0 %2148, %v2348_v5  }
  0x4f   :  { %282 = vperm.xlu1 %2149, %v2368_v9   ;;  %285 = vperm.xlu0 %2148, %v2363_v8  }
  0x53   :  { %2150 = vset.pattern.permute.xlu1 %v2285_v60  ;;  %2153 = vset.pattern.permute.xlu0 %v2286_v61 }
  0x54   :  { %392 = vperm.xlu1 %2150, %v2329_v1   ;;  %558 = vperm.xlu0 %2153, %v2324_v0  }
  0x58   :  { %2151 = vset.pattern.permute.xlu1 %v2286_v61  ;;  %2154 = vset.pattern.permute.xlu0 %v2285_v60 }
  0x59   :  { %552 = vperm.xlu1 %2151, %v2329_v1   ;;  %395 = vperm.xlu0 %2154, %v2341_v4   ;;  %v776_v1 = vld [vmem:[%s3431_s2 + $0x8] sm:$0xff] }
  0x5a   :  { %2006 = vmatprep.subr.mxu0 %v776_v1 }
  0x5b   :  { %2007 = vmatpush3.msra.mxu0 %v776_v1 }
  0x5d   :  { %555 = vperm.xlu1 %2151, %v2341_v4   ;;  %398 = vperm.xlu0 %2154, %v2324_v0   ;;  %v775_v0 = vld [vmem:[%s3431_s2] sm:$0xff]  ;;  %v53_v4 = vlaneseq }
  0x5e   :  { %2008 = vmatprep.subr.mxu0 %v775_v0 }
  0x5f   :  { %2009 = vmatpush3.msra.mxu0 %v775_v0 }
  0x61   :  { %2152 = vset.pattern.permute.xlu1 %v2285_v60  ;;  %407 = vperm.xlu0 %2154, %v2348_v5  }
  0x62   :  { %401 = vperm.xlu1 %2152, %v2336_v3  }
  0x65   :  { %410 = vperm.xlu0 %2154, %v2368_v9  }
  0x66   :  { %2155 = vset.pattern.permute.xlu1 %v2286_v61 }
  0x67   :  { %561 = vperm.xlu1 %2155, %v2336_v3   ;;  %v2647_v3 = vand.u32 127, %v53_v4 }
  0x69   :  { %416 = vperm.xlu0 %2154, %v2386_v13  }
  0x6b   :  { %2156 = vset.pattern.permute.xlu1 %v2285_v60 }
  0x6c   :  { %404 = vperm.xlu1 %2156, %v2353_v6  }
  0x6d   :  { %422 = vperm.xlu0 %2154, %v2404_v17  }
  0x70   :  { %2157 = vset.pattern.permute.xlu1 %v2286_v61 }
  0x71   :  { %564 = vperm.xlu1 %2157, %v2353_v6   ;;  %428 = vperm.xlu0 %2154, %v2419_v20  }
  0x75   :  { %567 = vperm.xlu1 %2157, %v2348_v5   ;;  %434 = vperm.xlu0 %2154, %v2437_v24   ;;  %v2287_v5 = vmov 1.0  }
  0x79   :  { %2158 = vset.pattern.permute.xlu1 %v2285_v60  ;;  %440 = vperm.xlu0 %2154, %v2452_v27  }
  0x7a   :  { %413 = vperm.xlu1 %2158, %v2363_v8  }
  0x7d   :  { %v63_v10 = vpop.permute.xlu1 %62  ;;  %446 = vperm.xlu0 %2154, %v2470_v31   ;;  %v57_v11 = vpop.permute.xlu0 %56 }
  0x7e   :  { %2159 = vset.pattern.permute.xlu1 %v2286_v61  ;;  %vm151_vm0 = vcmp.eq.s32.totalorder %v2647_v3, %v57_v11  ;;  %vm153_vm2 = vcmp.eq.s32.totalorder %v2647_v3, %v63_v10 }
  0x7f   :  { %573 = vperm.xlu1 %2159, %v2363_v8   ;;  %2090 = vmatprep.mubr.msk.f32.mxu1 %vm151_vm0, %v2287_v5 }
  0x81   :  { %v66_v6 = vpop.permute.xlu1 %65  ;;  %452 = vperm.xlu0 %2154, %v2485_v34   ;;  %v60_v14 = vpop.permute.xlu0 %59 }
  0x82   :  { %vm152_vm1 = vcmp.eq.s32.totalorder %v2647_v3, %v60_v14  ;;  %vm154_vm3 = vcmp.eq.s32.totalorder %v2647_v3, %v66_v6 }
  0x83   :  { %2160 = vset.pattern.permute.xlu1 %v2284_v53  ;;  %2091 = vmatmul.mubr.msk.f32.vlgmr.msra.gmra.mxu1 %vm152_vm1, %v2287_v5 }
  0x84   :  { %288 = vperm.xlu1 %2160, %v2386_v13   ;;  %2093 = vmatprep.mubr.msk.f32.mxu1 %vm153_vm2, %v2287_v5 }
  0x85   :  { %v72_v8 = vpop.permute.xlu1 %71  ;;  %458 = vperm.xlu0 %2154, %v2503_v38   ;;  %v69_v15 = vpop.permute.xlu0 %68 }
  0x86   :  { %vm155_vm4 = vcmp.eq.s32.totalorder %v2647_v3, %v69_v15  ;;  %vm156_vm5 = vcmp.eq.s32.totalorder %v2647_v3, %v72_v8 }
  0x87   :  { %2094 = vmatmul.mubr.msk.f32.gmra.mxu1 %vm154_vm3, %v2287_v5 }
  0x88   :  { %291 = vperm.xlu1 %2160, %v2381_v12   ;;  %2096 = vmatprep.mubr.msk.f32.mxu1 %vm155_vm4, %v2287_v5 }
  0x89   :  { %v78_v18 = vpop.permute.xlu1 %77  ;;  %464 = vperm.xlu0 %2154, %v2518_v41   ;;  %v75_v21 = vpop.permute.xlu0 %74 }
  0x8a   :  { %vm157_vm6 = vcmp.eq.s32.totalorder %v2647_v3, %v75_v21  ;;  %vm158_vm7 = vcmp.eq.s32.totalorder %v2647_v3, %v78_v18 }
  0x8b   :  { %2097 = vmatmul.mubr.msk.f32.gmra.mxu1 %vm156_vm5, %v2287_v5 }
  0x8c   :  { %2161 = vset.pattern.permute.xlu1 %v2285_v60  ;;  %2099 = vmatprep.mubr.msk.f32.mxu1 %vm157_vm6, %v2287_v5 }
  0x8d   :  { %v84_v22 = vpop.permute.xlu1 %83  ;;  %419 = vperm.xlu1 %2161, %v2381_v12   ;;  %470 = vperm.xlu0 %2154, %v2533_v44   ;;  %v81_v25 = vpop.permute.xlu0 %80 }
  0x8e   :  { %vm159_vm8 = vcmp.eq.s32.totalorder %v2647_v3, %v81_v25  ;;  %vm160_vm9 = vcmp.eq.s32.totalorder %v2647_v3, %v84_v22 }
  0x8f   :  { %2100 = vmatmul.mubr.msk.f32.gmra.mxu1 %vm158_vm7, %v2287_v5 }
  0x90   :  { %2102 = vmatprep.mubr.msk.f32.mxu1 %vm159_vm8, %v2287_v5 }
  0x91   :  { %v90_v28 = vpop.permute.xlu1 %89  ;;  %2162 = vset.pattern.permute.xlu1 %v2286_v61  ;;  %476 = vperm.xlu0 %2154, %v2545_v46   ;;  %v87_v29 = vpop.permute.xlu0 %86 }
  0x92   :  { %579 = vperm.xlu1 %2162, %v2381_v12   ;;  %vm161_vm10 = vcmp.eq.s32.totalorder %v2647_v3, %v87_v29  ;;  %vm162_vm11 = vcmp.eq.s32.totalorder %v2647_v3, %v90_v28 }
  0x93   :  { %2103 = vmatmul.mubr.msk.f32.gmra.mxu1 %vm160_vm9, %v2287_v5 }
  0x94   :  { %2105 = vmatprep.mubr.msk.f32.mxu1 %vm161_vm10, %v2287_v5 }
  0x95   :  { %v96_v32 = vpop.permute.xlu1 %95  ;;  %482 = vperm.xlu0 %2154, %v2560_v49   ;;  %v93_v35 = vpop.permute.xlu0 %92 }
  0x96   :  { %2163 = vset.pattern.permute.xlu1 %v2284_v53  ;;  %vm163_vm12 = vcmp.eq.s32.totalorder %v2647_v3, %v93_v35  ;;  %vm164_vm13 = vcmp.eq.s32.totalorder %v2647_v3, %v96_v32 }
  0x97   :  { %294 = vperm.xlu1 %2163, %v2404_v17   ;;  %2106 = vmatmul.mubr.msk.f32.gmra.mxu1 %vm162_vm11, %v2287_v5 }
  0x98   :  { %2108 = vmatprep.mubr.msk.f32.mxu1 %vm163_vm12, %v2287_v5 }
  0x99   :  { %v102_v12 = vpop.permute.xlu1 %101  ;;  %2194 = vset.pattern.permute.xlu0 %v2286_v61  ;;  %v99_v36 = vpop.permute.xlu0 %98 }
  0x9a   :  { %570 = vperm.xlu0 %2194, %v2368_v9   ;;  %vm165_vm14 = vcmp.eq.s32.totalorder %v2647_v3, %v99_v36  ;;  %vm166_vm15 = vcmp.eq.s32.totalorder %v2647_v3, %v102_v12 }
  0x9b   :  { %297 = vperm.xlu1 %2163, %v2399_v16   ;;  %2109 = vmatmul.mubr.msk.f32.gmra.mxu1 %vm164_vm13, %v2287_v5 }
  0x9c   :  { %2111 = vmatprep.mubr.msk.f32.mxu1 %vm165_vm14, %v2287_v5 }
  0x9d   :  { %v108_v39 = vpop.permute.xlu1 %107  ;;  %v105_v42 = vpop.permute.xlu0 %104 }
  0x9e   :  { %576 = vperm.xlu0 %2194, %v2386_v13   ;;  %vm167_vm0 = vcmp.eq.s32.totalorder %v2647_v3, %v105_v42  ;;  %vm168_vm1 = vcmp.eq.s32.totalorder %v2647_v3, %v108_v39 }
  0x9f   :  { %2164 = vset.pattern.permute.xlu1 %v2285_v60  ;;  %2112 = vmatmul.mubr.msk.f32.gmra.mxu1 %vm166_vm15, %v2287_v5 }
  0xa0   :  { %425 = vperm.xlu1 %2164, %v2399_v16   ;;  %2114 = vmatprep.mubr.msk.f32.mxu1 %vm167_vm0, %v2287_v5 }
  0xa1   :  { %v114_v9 = vpop.permute.xlu1 %113  ;;  %v111_v47 = vpop.permute.xlu0 %110 }
  0xa2   :  { %582 = vperm.xlu0 %2194, %v2404_v17   ;;  %vm169_vm2 = vcmp.eq.s32.totalorder %v2647_v3, %v111_v47  ;;  %vm170_vm3 = vcmp.eq.s32.totalorder %v2647_v3, %v114_v9 }
  0xa3   :  { %2115 = vmatmul.mubr.msk.f32.gmra.mxu1 %vm168_vm1, %v2287_v5 }
  0xa4   :  { %2165 = vset.pattern.permute.xlu1 %v2286_v61  ;;  %2117 = vmatprep.mubr.msk.f32.mxu1 %vm169_vm2, %v2287_v5 }
  0xa5   :  { %v120_v13 = vpop.permute.xlu1 %119  ;;  %585 = vperm.xlu1 %2165, %v2399_v16   ;;  %v117_v50 = vpop.permute.xlu0 %116 }
  0xa6   :  { %vm171_vm4 = vcmp.eq.s32.totalorder %v2647_v3, %v117_v50  ;;  %588 = vperm.xlu0 %2194, %v2419_v20   ;;  %vm172_vm5 = vcmp.eq.s32.totalorder %v2647_v3, %v120_v13 }
  0xa7   :  { %2118 = vmatmul.mubr.msk.f32.gmra.mxu1 %vm170_vm3, %v2287_v5 }
  0xa8   :  { %2120 = vmatprep.mubr.msk.f32.mxu1 %vm171_vm4, %v2287_v5 }
  0xa9   :  { %v126_v17 = vpop.permute.xlu1 %125  ;;  %2166 = vset.pattern.permute.xlu1 %v2284_v53  ;;  %v123_v51 = vpop.permute.xlu0 %122 }
  0xaa   :  { %300 = vperm.xlu1 %2166, %v2419_v20   ;;  %vm173_vm6 = vcmp.eq.s32.totalorder %v2647_v3, %v123_v51  ;;  %594 = vperm.xlu0 %2194, %v2437_v24   ;;  %vm174_vm7 = vcmp.eq.s32.totalorder %v2647_v3, %v126_v17 }
  0xab   :  { %2121 = vmatmul.mubr.msk.f32.gmra.mxu1 %vm172_vm5, %v2287_v5 }
  0xac   :  { %2123 = vmatprep.mubr.msk.f32.mxu1 %vm173_vm6, %v2287_v5 }
  0xad   :  { %v132_v16 = vpop.permute.xlu1 %131  ;;  %v129_v52 = vpop.permute.xlu0 %128 }
  0xae   :  { %303 = vperm.xlu1 %2166, %v2414_v19   ;;  %vm175_vm8 = vcmp.eq.s32.totalorder %v2647_v3, %v129_v52  ;;  %600 = vperm.xlu0 %2194, %v2452_v27   ;;  %vm176_vm9 = vcmp.eq.s32.totalorder %v2647_v3, %v132_v16 }
  0xaf   :  { %2124 = vmatmul.mubr.msk.f32.gmra.mxu1 %vm174_vm7, %v2287_v5 }
  0xb0   :  { %2126 = vmatprep.mubr.msk.f32.mxu1 %vm175_vm8, %v2287_v5 }
  0xb1   :  { %v138_v20 = vpop.permute.xlu1 %137  ;;  %v135_v54 = vpop.permute.xlu0 %134 }
  0xb2   :  { %2167 = vset.pattern.permute.xlu1 %v2285_v60  ;;  %vm177_vm10 = vcmp.eq.s32.totalorder %v2647_v3, %v135_v54  ;;  %606 = vperm.xlu0 %2194, %v2470_v31   ;;  %vm178_vm11 = vcmp.eq.s32.totalorder %v2647_v3, %v138_v20 }
  0xb3   :  { %431 = vperm.xlu1 %2167, %v2414_v19   ;;  %2127 = vmatmul.mubr.msk.f32.gmra.mxu1 %vm176_vm9, %v2287_v5 }
  0xb4   :  { %2129 = vmatprep.mubr.msk.f32.mxu1 %vm177_vm10, %v2287_v5 }
  0xb5   :  { %v144_v55 = vpop.permute.xlu1 %143  ;;  %v141_v56 = vpop.permute.xlu0 %140 }
  0xb6   :  { %vm179_vm12 = vcmp.eq.s32.totalorder %v2647_v3, %v141_v56  ;;  %612 = vperm.xlu0 %2194, %v2485_v34   ;;  %vm180_vm13 = vcmp.eq.s32.totalorder %v2647_v3, %v144_v55 }
  0xb7   :  { %2168 = vset.pattern.permute.xlu1 %v2286_v61  ;;  %2130 = vmatmul.mubr.msk.f32.gmra.mxu1 %vm178_vm11, %v2287_v5 }
  0xb8   :  { %591 = vperm.xlu1 %2168, %v2414_v19   ;;  %2132 = vmatprep.mubr.msk.f32.mxu1 %vm179_vm12, %v2287_v5 }
  0xb9   :  { %v150_v57 = vpop.permute.xlu1 %149  ;;  %v147_v58 = vpop.permute.xlu0 %146 }
  0xba   :  { %vm181_vm14 = vcmp.eq.s32.totalorder %v2647_v3, %v147_v58  ;;  %618 = vperm.xlu0 %2194, %v2503_v38   ;;  %vm182_vm15 = vcmp.eq.s32.totalorder %v2647_v3, %v150_v57 }
  0xbb   :  { %2133 = vmatmul.mubr.msk.f32.gmra.mxu1 %vm180_vm13, %v2287_v5 }
  0xbc   :  { %2169 = vset.pattern.permute.xlu1 %v2284_v53  ;;  %2135 = vmatprep.mubr.msk.f32.mxu1 %vm181_vm14, %v2287_v5 }
  0xbd   :  { %306 = vperm.xlu1 %2169, %v2437_v24  }
  0xbe   :  { %v268_v19 = vpop.permute.xlu1 %267  ;;  %v265_v59 = vpop.permute.xlu0 %264  ;;  %624 = vperm.xlu0 %2194, %v2518_v41  }
  0xbf   :  { %2136 = vmatmul.mubr.msk.f32.gmra.mxu1 %vm182_vm15, %v2287_v5  ;;  %vm359_vm0 = vcmp.eq.s32.totalorder %v2647_v3, %v265_v59  ;;  %vm360_vm6 = vcmp.eq.s32.totalorder %v2647_v3, %v268_v19 }
  0xc1   :  { %309 = vperm.xlu1 %2169, %v2432_v23  }
  0xc2   :  { %v271_v62 = vpop.permute.xlu1 %270  ;;  %v274_v63 = vpop.permute.xlu0 %273  ;;  %630 = vperm.xlu0 %2194, %v2533_v44  }
  0xc3   :  { %vm361_vm11 = vcmp.eq.s32.totalorder %v2647_v3, %v271_v62  ;;  %vm362_vm15 = vcmp.eq.s32.totalorder %v2647_v3, %v274_v63 }
  0xc5   :  { %2170 = vset.pattern.permute.xlu1 %v2285_v60 }
  0xc6   :  { %v2759_v2 = vpop.permute.xlu1 %276  ;;  %437 = vperm.xlu1 %2170, %v2432_v23   ;;  %v2762_v24 = vpop.permute.xlu0 %279  ;;  %636 = vperm.xlu0 %2194, %v2545_v46  }
  0xca   :  { %v2765_v7 = vpop.permute.xlu1 %282  ;;  %2171 = vset.pattern.permute.xlu1 %v2286_v61  ;;  %v2768_v1 = vpop.permute.xlu0 %285  ;;  %642 = vperm.xlu0 %2194, %v2560_v49  }
  0xcb   :  { %597 = vperm.xlu1 %2171, %v2432_v23  }
  0xcf   :  { %2172 = vset.pattern.permute.xlu1 %v2284_v53  ;;  %v393_v0 = vpop.permute.xlu1 %392  ;;  %v559_v4 = vpop.permute.xlu0 %558 }
  0xd0   :  { %312 = vperm.xlu1 %2172, %v2452_v27   ;;  %vm487_vm1 = vcmp.eq.s32.totalorder %v2647_v3, %v393_v0  ;;  %vm649_vm7 = vcmp.eq.s32.totalorder %v2647_v3, %v559_v4 }
  0xd1   :  { %vm519_vm4 = vmor %vm359_vm0, %vm487_vm1 }
  0xd4   :  { %315 = vperm.xlu1 %2172, %v2447_v26   ;;  %v553_v10 = vpop.permute.xlu1 %552  ;;  %v396_v11 = vpop.permute.xlu0 %395 }
  0xd5   :  { %vm647_vm2 = vcmp.eq.s32.totalorder %v2647_v3, %v553_v10  ;;  %vm488_vm3 = vcmp.eq.s32.totalorder %v2647_v3, %v396_v11 }
  0xd6   :  { %vm679_vm5 = vmor %vm519_vm4, %vm647_vm2 }
  0xd7   :  { %2010 = vmatprep.mubr.msk.f32.mxu0 %vm679_vm5, %v2287_v5  ;;  %vm520_vm8 = vmor %vm360_vm6, %vm488_vm3  ;;  %vm363_vm5 = vcmp.eq.s32.totalorder %v2647_v3, %v2759_v2  ;;  %vm364_vm6 = vcmp.eq.s32.totalorder %v2647_v3, %v2762_v24 }
  0xd8   :  { %2173 = vset.pattern.permute.xlu1 %v2285_v60  ;;  %v556_v23 = vpop.permute.xlu1 %555  ;;  %v399_v27 = vpop.permute.xlu0 %398 }
  0xd9   :  { %vm648_vm9 = vcmp.eq.s32.totalorder %v2647_v3, %v556_v23  ;;  %vm489_vm10 = vcmp.eq.s32.totalorder %v2647_v3, %v399_v27  ;;  %443 = vperm.xlu1 %2173, %v2447_v26  }
  0xda   :  { %vm680_vm12 = vmor %vm520_vm8, %vm648_vm9 }
  0xdb   :  { %vm521_vm13 = vmor %vm361_vm11, %vm489_vm10  ;;  %2011 = vmatmul.mubr.msk.f32.vlgmr.msra.gmra.mxu0 %vm680_vm12, %v2287_v5 }
  0xdc   :  { %vm681_vm14 = vmor %vm521_vm13, %vm649_vm7  ;;  %v408_v6 = vpop.permute.xlu0 %407 }
  0xdd   :  { %2013 = vmatprep.mubr.msk.f32.mxu0 %vm681_vm14, %v2287_v5  ;;  %2174 = vset.pattern.permute.xlu1 %v2286_v61  ;;  %v402_v14 = vpop.permute.xlu1 %401  ;;  %vm492_vm7 = vcmp.eq.s32.totalorder %v2647_v3, %v408_v6 }
  0xde   :  { %603 = vperm.xlu1 %2174, %v2447_v26   ;;  %vm490_vm0 = vcmp.eq.s32.totalorder %v2647_v3, %v402_v14  ;;  %vm524_vm11 = vmor %vm364_vm6, %vm492_vm7 }
  0xdf   :  { %vm522_vm1 = vmor %vm362_vm15, %vm490_vm0  ;;  %vm366_vm15 = vcmp.eq.s32.totalorder %v2647_v3, %v2768_v1 }
  0xe0   :  { %v2793_v8 = vpop.permute.xlu0 %410 }
  0xe1   :  { %vm493_vm14 = vcmp.eq.s32.totalorder %v2647_v3, %v2793_v8 }
  0xe2   :  { %2175 = vset.pattern.permute.xlu1 %v2284_v53  ;;  %v562_v15 = vpop.permute.xlu1 %561 }
  0xe3   :  { %vm650_vm2 = vcmp.eq.s32.totalorder %v2647_v3, %v562_v15  ;;  %318 = vperm.xlu1 %2175, %v2470_v31  }
  0xe4   :  { %vm682_vm3 = vmor %vm522_vm1, %vm650_vm2  ;;  %v2798_v18 = vpop.permute.xlu0 %416  ;;  %vm365_vm1 = vcmp.eq.s32.totalorder %v2647_v3, %v2765_v7 }
  0xe5   :  { %2014 = vmatmul.mubr.msk.f32.gmra.mxu0 %vm682_vm3, %v2287_v5  ;;  %vm525_vm3 = vmor %vm365_vm1, %vm493_vm14 }
  0xe7   :  { %321 = vperm.xlu1 %2175, %v2465_v30   ;;  %v405_v26 = vpop.permute.xlu1 %404 }
  0xe8   :  { %v2802_v21 = vpop.permute.xlu0 %422  ;;  %vm491_vm4 = vcmp.eq.s32.totalorder %v2647_v3, %v405_v26 }
  0xe9   :  { %vm523_vm8 = vmor %vm363_vm5, %vm491_vm4  ;;  %vm495_vm4 = vcmp.eq.s32.totalorder %v2647_v3, %v2798_v18 }
  0xeb   :  { %2176 = vset.pattern.permute.xlu1 %v2285_v60 }
  0xec   :  { %449 = vperm.xlu1 %2176, %v2465_v30   ;;  %v565_v31 = vpop.permute.xlu1 %564  ;;  %v2812_v22 = vpop.permute.xlu0 %428 }
  0xed   :  { %vm651_vm9 = vcmp.eq.s32.totalorder %v2647_v3, %v565_v31 }
  0xee   :  { %vm683_vm10 = vmor %vm523_vm8, %vm651_vm9 }
  0xef   :  { %2016 = vmatprep.mubr.msk.f32.mxu0 %vm683_vm10, %v2287_v5 }
  0xf0   :  { %2177 = vset.pattern.permute.xlu1 %v2286_v61  ;;  %v568_v25 = vpop.permute.xlu1 %567  ;;  %v2817_v28 = vpop.permute.xlu0 %434 }
  0xf1   :  { %vm652_vm12 = vcmp.eq.s32.totalorder %v2647_v3, %v568_v25  ;;  %609 = vperm.xlu1 %2177, %v2465_v30  }
  0xf2   :  { %vm684_vm13 = vmor %vm524_vm11, %vm652_vm12 }
  0xf3   :  { %2017 = vmatmul.mubr.msk.f32.gmra.mxu0 %vm684_vm13, %v2287_v5 }
  0xf4   :  { %v2822_v29 = vpop.permute.xlu0 %440 }
  0xf5   :  { %2178 = vset.pattern.permute.xlu1 %v2284_v53  ;;  %v414_v32 = vpop.permute.xlu1 %413 }
  0xf6   :  { %324 = vperm.xlu1 %2178, %v2485_v34   ;;  %vm494_vm0 = vcmp.eq.s32.totalorder %v2647_v3, %v414_v32 }
  0xf7   :  { %vm526_vm5 = vmor %vm366_vm15, %vm494_vm0  ;;  %vm497_vm0 = vcmp.eq.s32.totalorder %v2647_v3, %v2802_v21 }
  0xf8   :  { %v2826_v35 = vpop.permute.xlu0 %446 }
  0xfa   :  { %327 = vperm.xlu1 %2178, %v2480_v33   ;;  %v574_v12 = vpop.permute.xlu1 %573 }
  0xfb   :  { %vm654_vm2 = vcmp.eq.s32.totalorder %v2647_v3, %v574_v12 }
  0xfc   :  { %v2829_v36 = vpop.permute.xlu0 %452  ;;  %vm686_vm10 = vmor %vm526_vm5, %vm654_vm2 }
  0xfe   :  { %2179 = vset.pattern.permute.xlu1 %v2285_v60 }
  0xff   :  { %455 = vperm.xlu1 %2179, %v2480_v33   ;;  %v289_v30 = vpop.permute.xlu1 %288 }
 0x100   :  { %v2833_v39 = vpop.permute.xlu0 %458  ;;  %vm367_vm6 = vcmp.eq.s32.totalorder %v2647_v3, %v289_v30 }
 0x101   :  { %vm527_vm13 = vmor %vm367_vm6, %vm495_vm4 }
 0x103   :  { %2180 = vset.pattern.permute.xlu1 %v2286_v61  ;;  %v292_v42 = vpop.permute.xlu1 %291 }
 0x104   :  { %615 = vperm.xlu1 %2180, %v2480_v33   ;;  %v2837_v34 = vpop.permute.xlu0 %464  ;;  %vm368_vm11 = vcmp.eq.s32.totalorder %v2647_v3, %v292_v42 }
 0x108   :  { %2181 = vset.pattern.permute.xlu1 %v2284_v53  ;;  %v420_v9 = vpop.permute.xlu1 %419  ;;  %v2840_v47 = vpop.permute.xlu0 %470 }
 0x109   :  { %330 = vperm.xlu1 %2181, %v2503_v38   ;;  %vm496_vm8 = vcmp.eq.s32.totalorder %v2647_v3, %v420_v9 }
 0x10a   :  { %vm528_vm14 = vmor %vm368_vm11, %vm496_vm8 }
 0x10c   :  { %v2843_v13 = vpop.permute.xlu0 %476 }
 0x10d   :  { %333 = vperm.xlu1 %2181, %v2498_v37   ;;  %v580_v50 = vpop.permute.xlu1 %579 }
 0x10e   :  { %vm656_vm12 = vcmp.eq.s32.totalorder %v2647_v3, %v580_v50 }
 0x10f   :  { %vm688_vm2 = vmor %vm528_vm14, %vm656_vm12  ;;  %vm499_vm12 = vcmp.eq.s32.totalorder %v2647_v3, %v2812_v22 }
 0x110   :  { %v2846_v17 = vpop.permute.xlu0 %482 }
 0x111   :  { %2182 = vset.pattern.permute.xlu1 %v2285_v60 }
 0x112   :  { %461 = vperm.xlu1 %2182, %v2498_v37   ;;  %v295_v33 = vpop.permute.xlu1 %294 }
 0x113   :  { %vm369_vm1 = vcmp.eq.s32.totalorder %v2647_v3, %v295_v33 }
 0x114   :  { %vm529_vm5 = vmor %vm369_vm1, %vm497_vm0 }
 0x115   :  { %v571_v38 = vpop.permute.xlu0 %570 }
 0x116   :  { %vm653_vm7 = vcmp.eq.s32.totalorder %v2647_v3, %v571_v38  ;;  %2183 = vset.pattern.permute.xlu1 %v2286_v61  ;;  %v298_v51 = vpop.permute.xlu1 %297 }
 0x117   :  { %vm685_vm9 = vmor %vm525_vm3, %vm653_vm7  ;;  %621 = vperm.xlu1 %2183, %v2498_v37   ;;  %vm370_vm8 = vcmp.eq.s32.totalorder %v2647_v3, %v298_v51 }
 0x118   :  { %2019 = vmatprep.mubr.msk.f32.mxu0 %vm685_vm9, %v2287_v5 }
 0x119   :  { %2020 = vmatmul.mubr.msk.f32.gmra.mxu0 %vm686_vm10, %v2287_v5  ;;  %v577_v16 = vpop.permute.xlu0 %576 }
 0x11a   :  { %vm655_vm15 = vcmp.eq.s32.totalorder %v2647_v3, %v577_v16 }
 0x11b   :  { %vm687_vm3 = vmor %vm527_vm13, %vm655_vm15  ;;  %2184 = vset.pattern.permute.xlu1 %v2284_v53  ;;  %v426_v37 = vpop.permute.xlu1 %425 }
 0x11c   :  { %336 = vperm.xlu1 %2184, %v2518_v41   ;;  %2022 = vmatprep.mubr.msk.f32.mxu0 %vm687_vm3, %v2287_v5  ;;  %vm498_vm4 = vcmp.eq.s32.totalorder %v2647_v3, %v426_v37 }
 0x11d   :  { %2023 = vmatmul.mubr.msk.f32.gmra.mxu0 %vm688_vm2, %v2287_v5  ;;  %v583_v52 = vpop.permute.xlu0 %582  ;;  %vm530_vm9 = vmor %vm370_vm8, %vm498_vm4 }
 0x11e   :  { %vm657_vm6 = vcmp.eq.s32.totalorder %v2647_v3, %v583_v52 }
 0x11f   :  { %vm689_vm7 = vmor %vm529_vm5, %vm657_vm6  ;;  %vm501_vm6 = vcmp.eq.s32.totalorder %v2647_v3, %v2817_v28 }
 0x120   :  { %339 = vperm.xlu1 %2184, %v2513_v40   ;;  %v586_v20 = vpop.permute.xlu1 %585  ;;  %2025 = vmatprep.mubr.msk.f32.mxu0 %vm689_vm7, %v2287_v5 }
 0x121   :  { %vm658_vm10 = vcmp.eq.s32.totalorder %v2647_v3, %v586_v20  ;;  %v589_v41 = vpop.permute.xlu0 %588 }
 0x122   :  { %vm690_vm11 = vmor %vm530_vm9, %vm658_vm10  ;;  %vm659_vm13 = vcmp.eq.s32.totalorder %v2647_v3, %v589_v41 }
 0x123   :  { %2026 = vmatmul.mubr.msk.f32.gmra.mxu0 %vm690_vm11, %v2287_v5 }
 0x124   :  { %2185 = vset.pattern.permute.xlu1 %v2285_v60 }
 0x125   :  { %467 = vperm.xlu1 %2185, %v2513_v40   ;;  %v301_v54 = vpop.permute.xlu1 %300  ;;  %v595_v58 = vpop.permute.xlu0 %594 }
 0x126   :  { %vm371_vm14 = vcmp.eq.s32.totalorder %v2647_v3, %v301_v54  ;;  %vm661_vm7 = vcmp.eq.s32.totalorder %v2647_v3, %v595_v58 }
 0x127   :  { %vm531_vm15 = vmor %vm371_vm14, %vm499_vm12 }
 0x128   :  { %vm691_vm0 = vmor %vm531_vm15, %vm659_vm13 }
 0x129   :  { %2186 = vset.pattern.permute.xlu1 %v2286_v61  ;;  %v304_v55 = vpop.permute.xlu1 %303  ;;  %2028 = vmatprep.mubr.msk.f32.mxu0 %vm691_vm0, %v2287_v5  ;;  %v601_v62 = vpop.permute.xlu0 %600  ;;  %vm503_vm0 = vcmp.eq.s32.totalorder %v2647_v3, %v2822_v29 }
 0x12a   :  { %627 = vperm.xlu1 %2186, %v2513_v40   ;;  %vm372_vm3 = vcmp.eq.s32.totalorder %v2647_v3, %v304_v55 }
 0x12d   :  { %v607_v24 = vpop.permute.xlu0 %606 }
 0x12e   :  { %2187 = vset.pattern.permute.xlu1 %v2284_v53  ;;  %v432_v56 = vpop.permute.xlu1 %431 }
 0x12f   :  { %342 = vperm.xlu1 %2187, %v2533_v44   ;;  %vm500_vm1 = vcmp.eq.s32.totalorder %v2647_v3, %v432_v56 }
 0x130   :  { %vm532_vm2 = vmor %vm372_vm3, %vm500_vm1  ;;  %vm663_vm1 = vcmp.eq.s32.totalorder %v2647_v3, %v601_v62 }
 0x131   :  { %v613_v7 = vpop.permute.xlu0 %612 }
 0x133   :  { %345 = vperm.xlu1 %2187, %v2528_v43   ;;  %v592_v57 = vpop.permute.xlu1 %591 }
 0x134   :  { %vm660_vm4 = vcmp.eq.s32.totalorder %v2647_v3, %v592_v57 }
 0x135   :  { %vm692_vm5 = vmor %vm532_vm2, %vm660_vm4  ;;  %v619_v4 = vpop.permute.xlu0 %618 }
 0x136   :  { %2029 = vmatmul.mubr.msk.f32.gmra.mxu0 %vm692_vm5, %v2287_v5 }
 0x137   :  { %2188 = vset.pattern.permute.xlu1 %v2285_v60 }
 0x138   :  { %473 = vperm.xlu1 %2188, %v2528_v43   ;;  %v307_v40 = vpop.permute.xlu1 %306 }
 0x139   :  { %vm373_vm8 = vcmp.eq.s32.totalorder %v2647_v3, %v307_v40  ;;  %v625_v6 = vpop.permute.xlu0 %624 }
 0x13a   :  { %vm533_vm9 = vmor %vm373_vm8, %vm501_vm6 }
 0x13b   :  { %vm693_vm10 = vmor %vm533_vm9, %vm661_vm7 }
 0x13c   :  { %2189 = vset.pattern.permute.xlu1 %v2286_v61  ;;  %v310_v44 = vpop.permute.xlu1 %309  ;;  %2031 = vmatprep.mubr.msk.f32.mxu0 %vm693_vm10, %v2287_v5  ;;  %vm505_vm10 = vcmp.eq.s32.totalorder %v2647_v3, %v2826_v35 }
 0x13d   :  { %633 = vperm.xlu1 %2189, %v2528_v43   ;;  %vm374_vm12 = vcmp.eq.s32.totalorder %v2647_v3, %v310_v44 }
 0x141   :  { %2190 = vset.pattern.permute.xlu1 %v2284_v53  ;;  %v438_v19 = vpop.permute.xlu1 %437 }
 0x142   :  { %348 = vperm.xlu1 %2190, %v2545_v46   ;;  %vm502_vm11 = vcmp.eq.s32.totalorder %v2647_v3, %v438_v19 }
 0x143   :  { %vm534_vm13 = vmor %vm374_vm12, %vm502_vm11  ;;  %vm665_vm11 = vcmp.eq.s32.totalorder %v2647_v3, %v607_v24  ;;  %v2092_v8 = vpop.f32.mrf.mxu1 }
 0x145   :  { %v1082_v21 = vpop.f32.mrf.mxu1 }
 0x146   :  { %351 = vperm.xlu1 %2190, %v2540_v45   ;;  %v598_v59 = vpop.permute.xlu1 %597 }
 0x147   :  { %vm662_vm14 = vcmp.eq.s32.totalorder %v2647_v3, %v598_v59  ;;  %v2095_v28 = vpop.f32.mrf.mxu1 }
 0x148   :  { %vm694_vm15 = vmor %vm534_vm13, %vm662_vm14 }
 0x149   :  { %2032 = vmatmul.mubr.msk.f32.gmra.mxu0 %vm694_vm15, %v2287_v5  ;;  %v1092_v12 = vpop.f32.mrf.mxu1 }
 0x14a   :  { %2191 = vset.pattern.permute.xlu1 %v2285_v60 }
 0x14b   :  { %479 = vperm.xlu1 %2191, %v2540_v45   ;;  %v313_v43 = vpop.permute.xlu1 %312  ;;  %v2098_v9 = vpop.f32.mrf.mxu1 }
 0x14c   :  { %vm375_vm3 = vcmp.eq.s32.totalorder %v2647_v3, %v313_v43 }
 0x14d   :  { %vm535_vm2 = vmor %vm375_vm3, %vm503_vm0  ;;  %v1102_v51 = vpop.f32.mrf.mxu1 }
 0x14e   :  { %vm695_vm4 = vmor %vm535_vm2, %vm663_vm1 }
 0x14f   :  { %2192 = vset.pattern.permute.xlu1 %v2286_v61  ;;  %v316_v46 = vpop.permute.xlu1 %315  ;;  %2034 = vmatprep.mubr.msk.f32.mxu0 %vm695_vm4, %v2287_v5  ;;  %vm667_vm4 = vcmp.eq.s32.totalorder %v2647_v3, %v613_v7  ;;  %v2101_v56 = vpop.f32.mrf.mxu1 }
 0x150   :  { %639 = vperm.xlu1 %2192, %v2540_v45   ;;  %vm376_vm6 = vcmp.eq.s32.totalorder %v2647_v3, %v316_v46 }
 0x151   :  { %v1112_v58 = vpop.f32.mrf.mxu1 }
 0x153   :  { %v2104_v44 = vpop.f32.mrf.mxu1 }
 0x154   :  { %2193 = vset.pattern.permute.xlu1 %v2284_v53  ;;  %v444_v63 = vpop.permute.xlu1 %443 }
 0x155   :  { %354 = vperm.xlu1 %2193, %v2560_v49   ;;  %vm504_vm5 = vcmp.eq.s32.totalorder %v2647_v3, %v444_v63 }
 0x156   :  { %vm536_vm7 = vmor %vm376_vm6, %vm504_vm5  ;;  %vm507_vm5 = vcmp.eq.s32.totalorder %v2647_v3, %v2829_v36 }
 0x159   :  { %357 = vperm.xlu1 %2193, %v2555_v48   ;;  %v604_v2 = vpop.permute.xlu1 %603 }
 0x15a   :  { %vm664_vm8 = vcmp.eq.s32.totalorder %v2647_v3, %v604_v2 }
 0x15b   :  { %vm696_vm9 = vmor %vm536_vm7, %vm664_vm8 }
 0x15c   :  { %2035 = vmatmul.mubr.msk.f32.gmra.mxu0 %vm696_vm9, %v2287_v5 }
 0x15d   :  { %2195 = vset.pattern.permute.xlu1 %v2285_v60 }
 0x15e   :  { %485 = vperm.xlu1 %2195, %v2555_v48   ;;  %v319_v45 = vpop.permute.xlu1 %318 }
 0x15f   :  { %vm377_vm12 = vcmp.eq.s32.totalorder %v2647_v3, %v319_v45 }
 0x160   :  { %vm537_vm13 = vmor %vm377_vm12, %vm505_vm10 }
 0x161   :  { %vm697_vm14 = vmor %vm537_vm13, %vm665_vm11 }
 0x162   :  { %2196 = vset.pattern.permute.xlu1 %v2286_v61  ;;  %v322_v49 = vpop.permute.xlu1 %321  ;;  %2037 = vmatprep.mubr.msk.f32.mxu0 %vm697_vm14, %v2287_v5  ;;  %vm669_vm14 = vcmp.eq.s32.totalorder %v2647_v3, %v619_v4 }
 0x163   :  { %645 = vperm.xlu1 %2196, %v2555_v48   ;;  %vm378_vm0 = vcmp.eq.s32.totalorder %v2647_v3, %v322_v49 }
 0x167   :  { %v450_v53 = vpop.permute.xlu1 %449 }
 0x168   :  { %vm506_vm15 = vcmp.eq.s32.totalorder %v2647_v3, %v450_v53 }
 0x169   :  { %vm538_vm1 = vmor %vm378_vm0, %vm506_vm15  ;;  %vm509_vm15 = vcmp.eq.s32.totalorder %v2647_v3, %v2833_v39  ;;  %v631_v39 = vpop.permute.xlu0 %630 }
 0x16c   :  { %v610_v60 = vpop.permute.xlu1 %609 }
 0x16d   :  { %vm666_vm3 = vcmp.eq.s32.totalorder %v2647_v3, %v610_v60  ;;  %v637_v20 = vpop.permute.xlu0 %636 }
 0x16e   :  { %vm698_vm2 = vmor %vm538_vm1, %vm666_vm3 }
 0x16f   :  { %2038 = vmatmul.mubr.msk.f32.gmra.mxu0 %vm698_vm2, %v2287_v5 }
 0x171   :  { %v325_v1 = vpop.permute.xlu1 %324 }
 0x172   :  { %vm379_vm6 = vcmp.eq.s32.totalorder %v2647_v3, %v325_v1 }
 0x173   :  { %vm539_vm7 = vmor %vm379_vm6, %vm507_vm5 }
 0x174   :  { %vm699_vm8 = vmor %vm539_vm7, %vm667_vm4 }
 0x175   :  { %v328_v48 = vpop.permute.xlu1 %327  ;;  %2040 = vmatprep.mubr.msk.f32.mxu0 %vm699_vm8, %v2287_v5  ;;  %vm671_vm8 = vcmp.eq.s32.totalorder %v2647_v3, %v625_v6 }
 0x176   :  { %vm380_vm10 = vcmp.eq.s32.totalorder %v2647_v3, %v328_v48 }
 0x17a   :  { %v456_v61 = vpop.permute.xlu1 %455 }
 0x17b   :  { %vm508_vm9 = vcmp.eq.s32.totalorder %v2647_v3, %v456_v61 }
 0x17c   :  { %vm540_vm11 = vmor %vm380_vm10, %vm508_vm9  ;;  %vm511_vm9 = vcmp.eq.s32.totalorder %v2647_v3, %v2837_v34 }
 0x17f   :  { %v616_v0 = vpop.permute.xlu1 %615 }
 0x180   :  { %vm668_vm12 = vcmp.eq.s32.totalorder %v2647_v3, %v616_v0 }
 0x181   :  { %vm700_vm13 = vmor %vm540_vm11, %vm668_vm12 }
 0x182   :  { %2041 = vmatmul.mubr.msk.f32.gmra.mxu0 %vm700_vm13, %v2287_v5 }
 0x184   :  { %v331_v10 = vpop.permute.xlu1 %330 }
 0x185   :  { %vm381_vm0 = vcmp.eq.s32.totalorder %v2647_v3, %v331_v10 }
 0x186   :  { %vm541_vm1 = vmor %vm381_vm0, %vm509_vm15 }
 0x187   :  { %vm701_vm3 = vmor %vm541_vm1, %vm669_vm14 }
 0x188   :  { %v334_v11 = vpop.permute.xlu1 %333  ;;  %2043 = vmatprep.mubr.msk.f32.mxu0 %vm701_vm3, %v2287_v5  ;;  %vm673_vm3 = vcmp.eq.s32.totalorder %v2647_v3, %v631_v39 }
 0x189   :  { %vm382_vm4 = vcmp.eq.s32.totalorder %v2647_v3, %v334_v11 }
 0x18d   :  { %v462_v23 = vpop.permute.xlu1 %461 }
 0x18e   :  { %vm510_vm2 = vcmp.eq.s32.totalorder %v2647_v3, %v462_v23 }
 0x18f   :  { %vm542_vm5 = vmor %vm382_vm4, %vm510_vm2  ;;  %vm513_vm2 = vcmp.eq.s32.totalorder %v2647_v3, %v2840_v47 }
 0x192   :  { %v622_v27 = vpop.permute.xlu1 %621 }
 0x193   :  { %vm670_vm6 = vcmp.eq.s32.totalorder %v2647_v3, %v622_v27 }
 0x194   :  { %vm702_vm7 = vmor %vm542_vm5, %vm670_vm6 }
 0x195   :  { %2044 = vmatmul.mubr.msk.f32.gmra.mxu0 %vm702_vm7, %v2287_v5 }
 0x197   :  { %v337_v14 = vpop.permute.xlu1 %336 }
 0x198   :  { %vm383_vm10 = vcmp.eq.s32.totalorder %v2647_v3, %v337_v14 }
 0x199   :  { %vm543_vm11 = vmor %vm383_vm10, %vm511_vm9 }
 0x19a   :  { %vm703_vm12 = vmor %vm543_vm11, %vm671_vm8 }
 0x19b   :  { %v340_v15 = vpop.permute.xlu1 %339  ;;  %v2012_v18 = vpop.f32.mrf.mxu0  ;;  %2046 = vmatprep.mubr.msk.f32.mxu0 %vm703_vm12, %v2287_v5  ;;  %vm515_vm12 = vcmp.eq.s32.totalorder %v2647_v3, %v2843_v13 }
 0x19c   :  { %v2968_v26 = vadd.f32 %v2092_v8, %v2012_v18  ;;  %vm384_vm14 = vcmp.eq.s32.totalorder %v2647_v3, %v340_v15  ;;  %v643_v13 = vpop.permute.xlu0 %642 }
 0x19d   :  { %v857_v31 = vpop.f32.mrf.mxu0 }
 0x19e   :  { %v2970_v22 = vadd.f32 %v1082_v21, %v857_v31  ;;  %1245 = vadd.xlane.f32.xlu0 %v2968_v26 }
 0x1a0   :  { %v468_v25 = vpop.permute.xlu1 %467  ;;  %1243 = vadd.xlane.f32.xlu1 %v2970_v22 }
 0x1a1   :  { %vm512_vm13 = vcmp.eq.s32.totalorder %v2647_v3, %v468_v25 }
 0x1a2   :  { %vm544_vm15 = vmor %vm384_vm14, %vm512_vm13  ;;  %vm675_vm14 = vcmp.eq.s32.totalorder %v2647_v3, %v637_v20 }
 0x1a5   :  { %v628_v29 = vpop.permute.xlu1 %627  ;;  %v2015_v32 = vpop.f32.mrf.mxu0 }
 0x1a6   :  { %vm672_vm0 = vcmp.eq.s32.totalorder %v2647_v3, %v628_v29  ;;  %v2977_v35 = vadd.f32 %v2095_v28, %v2015_v32 }
 0x1a7   :  { %vm704_vm1 = vmor %vm544_vm15, %vm672_vm0  ;;  %v867_v36 = vpop.f32.mrf.mxu0 }
 0x1a8   :  { %v2979_v30 = vadd.f32 %v1092_v12, %v867_v36  ;;  %1249 = vadd.xlane.f32.xlu1 %v2977_v35  ;;  %2047 = vmatmul.mubr.msk.f32.gmra.mxu0 %vm704_vm1, %v2287_v5 }
 0x1aa   :  { %v343_v42 = vpop.permute.xlu1 %342  ;;  %1247 = vadd.xlane.f32.xlu0 %v2979_v30 }
 0x1ab   :  { %vm385_vm4 = vcmp.eq.s32.totalorder %v2647_v3, %v343_v42 }
 0x1ac   :  { %vm545_vm5 = vmor %vm385_vm4, %vm513_vm2 }
 0x1ad   :  { %vm705_vm6 = vmor %vm545_vm5, %vm673_vm3 }
 0x1ae   :  { %v346_v34 = vpop.permute.xlu1 %345  ;;  %2049 = vmatprep.mubr.msk.f32.mxu0 %vm705_vm6, %v2287_v5  ;;  %vm517_vm6 = vcmp.eq.s32.totalorder %v2647_v3, %v2846_v17  ;;  %v1122_v17 = vpop.f32.mrf.mxu1 }
 0x1af   :  { %vm386_vm8 = vcmp.eq.s32.totalorder %v2647_v3, %v346_v34 }
 0x1b0   :  { %v2107_v53 = vpop.f32.mrf.mxu1 }
 0x1b2   :  { %v1132_v1 = vpop.f32.mrf.mxu1 }
 0x1b3   :  { %v474_v50 = vpop.permute.xlu1 %473  ;;  %v2018_v33 = vpop.f32.mrf.mxu0 }
 0x1b4   :  { %v2989_v38 = vadd.f32 %v2098_v9, %v2018_v33  ;;  %vm514_vm7 = vcmp.eq.s32.totalorder %v2647_v3, %v474_v50  ;;  %v2110_v0 = vpop.f32.mrf.mxu1 }
 0x1b5   :  { %v877_v16 = vpop.f32.mrf.mxu0  ;;  %vm546_vm9 = vmor %vm386_vm8, %vm514_vm7  ;;  %vm677_vm8 = vcmp.eq.s32.totalorder %v2647_v3, %v643_v13 }
 0x1b6   :  { %v2992_v37 = vadd.f32 %v1102_v51, %v877_v16  ;;  %1253 = vadd.xlane.f32.xlu1 %v2989_v38  ;;  %v1142_v11 = vpop.f32.mrf.mxu1 }
 0x1b8   :  { %v634_v47 = vpop.permute.xlu1 %633  ;;  %1251 = vadd.xlane.f32.xlu0 %v2992_v37  ;;  %v2113_v27 = vpop.f32.mrf.mxu1 }
 0x1b9   :  { %vm674_vm10 = vcmp.eq.s32.totalorder %v2647_v3, %v634_v47 }
 0x1ba   :  { %vm706_vm11 = vmor %vm546_vm9, %vm674_vm10  ;;  %v1152_v8 = vpop.f32.mrf.mxu1 }
 0x1bb   :  { %2050 = vmatmul.mubr.msk.f32.gmra.mxu0 %vm706_vm11, %v2287_v5 }
 0x1bc   :  { %v2116_v21 = vpop.f32.mrf.mxu1 }
 0x1bd   :  { %v349_v52 = vpop.permute.xlu1 %348 }
 0x1be   :  { %vm387_vm13 = vcmp.eq.s32.totalorder %v2647_v3, %v349_v52  ;;  %v1162_v28 = vpop.f32.mrf.mxu1 }
 0x1bf   :  { %vm547_vm15 = vmor %vm387_vm13, %vm515_vm12 }
 0x1c0   :  { %vm707_vm0 = vmor %vm547_vm15, %vm675_vm14  ;;  %v2119_v12 = vpop.f32.mrf.mxu1 }
 0x1c1   :  { %v352_v41 = vpop.permute.xlu1 %351  ;;  %2052 = vmatprep.mubr.msk.f32.mxu0 %vm707_vm0, %v2287_v5  ;;  %vm1371_vm0 = vcmp.lt.s32.totalorder %v2647_v3, 32 }
 0x1c2   :  { %vm388_vm3 = vcmp.eq.s32.totalorder %v2647_v3, %v352_v41  ;;  %v1172_v42 = vpop.f32.mrf.mxu1 }
 0x1c4   :  { %v2122_v50 = vpop.f32.mrf.mxu1 }
 0x1c6   :  { %v480_v54 = vpop.permute.xlu1 %479  ;;  %v1182_v16 = vpop.f32.mrf.mxu1 }
 0x1c7   :  { %vm516_vm1 = vcmp.eq.s32.totalorder %v2647_v3, %v480_v54 }
 0x1c8   :  { %vm548_vm2 = vmor %vm388_vm3, %vm516_vm1  ;;  %v2125_v20 = vpop.f32.mrf.mxu1 }
 0x1cb   :  { %v640_v55 = vpop.permute.xlu1 %639 }
 0x1cc   :  { %vm676_vm4 = vcmp.eq.s32.totalorder %v2647_v3, %v640_v55  ;;  %v1192_v55 = vpop.f32.mrf.mxu1 }
 0x1cd   :  { %vm708_vm5 = vmor %vm548_vm2, %vm676_vm4 }
 0x1ce   :  { %2053 = vmatmul.mubr.msk.f32.gmra.mxu0 %vm708_vm5, %v2287_v5 }
 0x1d0   :  { %v355_v57 = vpop.permute.xlu1 %354 }
 0x1d1   :  { %vm389_vm7 = vcmp.eq.s32.totalorder %v2647_v3, %v355_v57  ;;  %v2128_v57 = vpop.f32.mrf.mxu1 }
 0x1d2   :  { %vm549_vm9 = vmor %vm389_vm7, %vm517_vm6 }
 0x1d3   :  { %vm709_vm10 = vmor %vm549_vm9, %vm677_vm8 }
 0x1d4   :  { %v358_v40 = vpop.permute.xlu1 %357  ;;  %2055 = vmatprep.mubr.msk.f32.mxu0 %vm709_vm10, %v2287_v5 }
 0x1d5   :  { %vm390_vm12 = vcmp.eq.s32.totalorder %v2647_v3, %v358_v40 }
 0x1d9   :  { %v486_v19 = vpop.permute.xlu1 %485  ;;  %v2021_v59 = vpop.f32.mrf.mxu0 }
 0x1da   :  { %v3013_v62 = vadd.f32 %v2101_v56, %v2021_v59  ;;  %vm518_vm11 = vcmp.eq.s32.totalorder %v2647_v3, %v486_v19 }
 0x1db   :  { %v887_v43 = vpop.f32.mrf.mxu0  ;;  %vm550_vm13 = vmor %vm390_vm12, %vm518_vm11 }
 0x1dc   :  { %v3016_v46 = vadd.f32 %v1112_v58, %v887_v43  ;;  %1257 = vadd.xlane.f32.xlu1 %v3013_v62 }
 0x1dd   :  { %v2024_v63 = vpop.f32.mrf.mxu0 }
 0x1de   :  { %v3020_v2 = vadd.f32 %v2104_v44, %v2024_v63  ;;  %v646_v24 = vpop.permute.xlu1 %645  ;;  %1255 = vadd.xlane.f32.xlu0 %v3016_v46  ;;  %v1202_v44 = vpop.f32.mrf.mxu1 }
 0x1df   :  { %vm678_vm14 = vcmp.eq.s32.totalorder %v2647_v3, %v646_v24  ;;  %v897_v45 = vpop.f32.mrf.mxu0 }
 0x1e0   :  { %vm710_vm15 = vmor %vm550_vm13, %vm678_vm14  ;;  %v3024_v49 = vadd.f32 %v1122_v17, %v897_v45  ;;  %1261 = vadd.xlane.f32.xlu1 %v3020_v2  ;;  %v2131_v43 = vpop.f32.mrf.mxu1 }
 0x1e1   :  { %2056 = vmatmul.mubr.msk.f32.gmra.mxu0 %vm710_vm15, %v2287_v5 }
 0x1e2   :  { %1259 = vadd.xlane.f32.xlu0 %v3024_v49  ;;  %v1212_v24 = vpop.f32.mrf.mxu1 }
 0x1e3   :  { %v2027_v60 = vpop.f32.mrf.mxu0 }
 0x1e4   :  { %v3029_v7 = vadd.f32 %v2107_v53, %v2027_v60  ;;  %v2134_v60 = vpop.f32.mrf.mxu1 }
 0x1e5   :  { %v907_v48 = vpop.f32.mrf.mxu0 }
 0x1e6   :  { %v3031_v61 = vadd.f32 %v1132_v1, %v907_v48  ;;  %1265 = vadd.xlane.f32.xlu1 %v3029_v7 }
 0x1e8   :  { %1263 = vadd.xlane.f32.xlu0 %v3031_v61 }
 0x1f6   :  { %v2030_v4 = vpop.f32.mrf.mxu0 }
 0x1f7   :  { %v3035_v10 = vadd.f32 %v2110_v0, %v2030_v4  ;;  %v1222_v0 = vpop.f32.mrf.mxu1 }
 0x1f8   :  { %v917_v23 = vpop.f32.mrf.mxu0 }
 0x1f9   :  { %v3037_v5 = vadd.f32 %v1142_v11, %v917_v23  ;;  %1269 = vadd.xlane.f32.xlu1 %v3035_v10 }
 0x1fb   :  { %1267 = vadd.xlane.f32.xlu0 %v3037_v5 }
 0x209   :  { %v2033_v6 = vpop.f32.mrf.mxu0 }
 0x20a   :  { %v3041_v14 = vadd.f32 %v2113_v27, %v2033_v6 }
 0x20b   :  { %v927_v15 = vpop.f32.mrf.mxu0 }
 0x20c   :  { %v3043_v18 = vadd.f32 %v1152_v8, %v927_v15  ;;  %1273 = vadd.xlane.f32.xlu1 %v3041_v14 }
 0x20e   :  { %1271 = vadd.xlane.f32.xlu0 %v3043_v18 }
 0x21c   :  { %v2036_v31 = vpop.f32.mrf.mxu0 }
 0x21d   :  { %v3047_v25 = vadd.f32 %v2116_v21, %v2036_v31 }
 0x21e   :  { %v937_v29 = vpop.f32.mrf.mxu0 }
 0x21f   :  { %v3049_v32 = vadd.f32 %v1162_v28, %v937_v29  ;;  %1277 = vadd.xlane.f32.xlu1 %v3047_v25  ;;  %v2137_v28 = vpop.f32.mrf.mxu1 }
 0x221   :  { %1275 = vadd.xlane.f32.xlu0 %v3049_v32 }
 0x227   :  { %v1246_v27 = vpop.xlane.xlu0 %1245 }
 0x228   :  { %v1308_v8 = vmul.f32 0.03125, %v1246_v27 }
 0x229   :  { %v1244_v23 = vpop.xlane.xlu1 %1243 }
 0x22a   :  { %v1307_v21 = vmul.f32 0.03125, %v1244_v23  ;;  %v1340_v29 = vsub.f32 %v2968_v26, %v1308_v8 }
 0x22f   :  { %v2039_v36 = vpop.f32.mrf.mxu0 }
 0x230   :  { %v3053_v39 = vadd.f32 %v2119_v12, %v2039_v36 }
 0x231   :  { %v947_v34 = vpop.f32.mrf.mxu0  ;;  %v1250_v6 = vpop.xlane.xlu1 %1249 }
 0x232   :  { %v3055_v9 = vadd.f32 %v1172_v42, %v947_v34  ;;  %1281 = vadd.xlane.f32.xlu1 %v3053_v39  ;;  %v1310_v12 = vmul.f32 0.03125, %v1250_v6  ;;  %v1339_v42 = vsub.f32 %v2970_v22, %v1307_v21 }
 0x233   :  { %v1248_v15 = vpop.xlane.xlu0 %1247 }
 0x234   :  { %1279 = vadd.xlane.f32.xlu0 %v3055_v9  ;;  %v1309_v34 = vmul.f32 0.03125, %v1248_v15  ;;  %v3104_v22 = vsel %vm1371_vm0, %v1339_v42, 0.0 }
 0x23f   :  { %v1254_v31 = vpop.xlane.xlu1 %1253 }
 0x241   :  { %v1252_v36 = vpop.xlane.xlu0 %1251 }
 0x242   :  { %v2042_v33 = vpop.f32.mrf.mxu0 }
 0x243   :  { %v3059_v51 = vadd.f32 %v2122_v50, %v2042_v33 }
 0x244   :  { %v957_v47 = vpop.f32.mrf.mxu0 }
 0x245   :  { %v3061_v52 = vadd.f32 %v1182_v16, %v957_v47  ;;  %1285 = vadd.xlane.f32.xlu1 %v3059_v51  ;;  %v1232_v47 = vpop.f32.mrf.mxu1 }
 0x247   :  { %1283 = vadd.xlane.f32.xlu0 %v3061_v52 }
 0x255   :  { %v2045_v41 = vpop.f32.mrf.mxu0 }
 0x256   :  { %v3065_v54 = vadd.f32 %v2125_v20, %v2045_v41  ;;  %v3096_v20 = vsel %vm1371_vm0, %v1340_v29, 0.0  ;;  %v1342_v41 = vsub.f32 %v2977_v35, %v1310_v12 }
 0x257   :  { %v967_v13 = vpop.f32.mrf.mxu0 }
 0x258   :  { %v3067_v56 = vadd.f32 %v1192_v55, %v967_v13  ;;  %1289 = vadd.xlane.f32.xlu1 %v3065_v54  ;;  %v1312_v55 = vmul.f32 0.03125, %v1254_v31  ;;  %v3112_v35 = vsel %vm1371_vm0, %v1342_v41, 0.0 }
 0x25a   :  { %1287 = vadd.xlane.f32.xlu0 %v3067_v56 }
 0x265   :  { %v1258_v33 = vpop.xlane.xlu1 %1257 }
 0x267   :  { %v1256_v13 = vpop.xlane.xlu0 %1255 }
 0x268   :  { %v2048_v58 = vpop.f32.mrf.mxu0 }
 0x269   :  { %v3071_v40 = vadd.f32 %v2128_v57, %v2048_v58  ;;  %v1341_v58 = vsub.f32 %v2979_v30, %v1309_v34 }
 0x26a   :  { %v977_v19 = vpop.f32.mrf.mxu0 }
 0x26b   :  { %v3073_v59 = vadd.f32 %v1202_v44, %v977_v19  ;;  %1293 = vadd.xlane.f32.xlu1 %v3071_v40  ;;  %v1311_v44 = vmul.f32 0.03125, %v1252_v36  ;;  %v1405_v19 = vmul.f32 %v3096_v20, %v3096_v20  ;;  %v3119_v30 = vsel %vm1371_vm0, %v1341_v58, 0.0 }
 0x26c   :  { %v1406_v8 = vmul.f32 %v3119_v30, %v3119_v30 }
 0x26d   :  { %1291 = vadd.xlane.f32.xlu0 %v3073_v59 }
 0x27b   :  { %v2051_v17 = vpop.f32.mrf.mxu0 }
 0x27c   :  { %v3077_v63 = vadd.f32 %v2131_v43, %v2051_v17  ;;  %v1344_v43 = vsub.f32 %v2989_v38, %v1312_v55  ;;  %v1314_v17 = vmul.f32 0.03125, %v1258_v33 }
 0x27d   :  { %v987_v45 = vpop.f32.mrf.mxu0 }
 0x27e   :  { %v3079_v53 = vadd.f32 %v1212_v24, %v987_v45  ;;  %1297 = vadd.xlane.f32.xlu1 %v3077_v63  ;;  %v1262_v24 = vpop.xlane.xlu1 %1261  ;;  %v1404_v45 = vmul.f32 %v3104_v22, %v3104_v22  ;;  %v3126_v38 = vsel %vm1371_vm0, %v1344_v43, 0.0  ;;  %v1346_v23 = vsub.f32 %v3013_v62, %v1314_v17 }
 0x27f   :  { %v1316_v27 = vmul.f32 0.03125, %v1262_v24 }
 0x280   :  { %1295 = vadd.xlane.f32.xlu0 %v3079_v53  ;;  %v3140_v62 = vsel %vm1371_vm0, %v1346_v23, 0.0 }
 0x281   :  { %v1348_v29 = vsub.f32 %v3020_v2, %v1316_v27 }
 0x282   :  { %v1266_v6 = vpop.xlane.xlu1 %1265 }
 0x283   :  { %v1318_v12 = vmul.f32 0.03125, %v1266_v6  ;;  %v3154_v2 = vsel %vm1371_vm0, %v1348_v29, 0.0 }
 0x284   :  { %v1413_v43 = vmul.f32 %v3154_v2, %v3154_v2 }
 0x285   :  { %v1350_v41 = vsub.f32 %v3029_v7, %v1318_v12 }
 0x286   :  { %v1270_v36 = vpop.xlane.xlu1 %1269 }
 0x287   :  { %v1320_v55 = vmul.f32 0.03125, %v1270_v36  ;;  %v3168_v7 = vsel %vm1371_vm0, %v1350_v41, 0.0 }
 0x288   :  { %v1415_v23 = vmul.f32 %v3168_v7, %v3168_v7 }
 0x289   :  { %v1352_v17 = vsub.f32 %v3035_v10, %v1320_v55 }
 0x28b   :  { %v3182_v10 = vsel %vm1371_vm0, %v1352_v17, 0.0 }
 0x28c   :  { %v1417_v29 = vmul.f32 %v3182_v10, %v3182_v10 }
 0x28e   :  { %v2054_v1 = vpop.f32.mrf.mxu0 }
 0x28f   :  { %v3083_v48 = vadd.f32 %v2134_v60, %v2054_v1  ;;  %v1343_v60 = vsub.f32 %v2992_v37, %v1311_v44  ;;  %v1313_v1 = vmul.f32 0.03125, %v1256_v13 }
 0x290   :  { %v997_v4 = vpop.f32.mrf.mxu0 }
 0x291   :  { %v3085_v11 = vadd.f32 %v1222_v0, %v997_v4  ;;  %1301 = vadd.xlane.f32.xlu1 %v3083_v48  ;;  %v1260_v0 = vpop.xlane.xlu0 %1259  ;;  %v1407_v4 = vmul.f32 %v3112_v35, %v3112_v35  ;;  %v3133_v37 = vsel %vm1371_vm0, %v1343_v60, 0.0  ;;  %v1345_v15 = vsub.f32 %v3016_v46, %v1313_v1 }
 0x292   :  { %v1315_v21 = vmul.f32 0.03125, %v1260_v0  ;;  %v1408_v42 = vmul.f32 %v3133_v37, %v3133_v37 }
 0x293   :  { %1299 = vadd.xlane.f32.xlu0 %v3085_v11  ;;  %v3147_v46 = vsel %vm1371_vm0, %v1345_v15, 0.0 }
 0x294   :  { %v1347_v34 = vsub.f32 %v3024_v49, %v1315_v21  ;;  %v1410_v13 = vmul.f32 %v3147_v46, %v3147_v46 }
 0x295   :  { %v1264_v31 = vpop.xlane.xlu0 %1263 }
 0x296   :  { %v3161_v49 = vsel %vm1371_vm0, %v1347_v34, 0.0 }
 0x297   :  { %v1412_v60 = vmul.f32 %v3161_v49, %v3161_v49 }
 0x299   :  { %v1268_v33 = vpop.xlane.xlu0 %1267 }
 0x29a   :  { %v1319_v44 = vmul.f32 0.03125, %v1268_v33 }
 0x29c   :  { %v1351_v1 = vsub.f32 %v3037_v5, %v1319_v44 }
 0x29e   :  { %v3189_v5 = vsel %vm1371_vm0, %v1351_v1, 0.0 }
 0x2a1   :  { %v2057_v50 = vpop.f32.mrf.mxu0 }
 0x2a2   :  { %v3092_v16 = vadd.f32 %v2137_v28, %v2057_v50  ;;  %v1409_v28 = vmul.f32 %v3126_v38, %v3126_v38  ;;  %v1317_v50 = vmul.f32 0.03125, %v1264_v31 }
 0x2a3   :  { %v1007_v26 = vpop.f32.mrf.mxu0 }
 0x2a4   :  { %v3099_v57 = vadd.f32 %v1232_v47, %v1007_v26  ;;  %1305 = vadd.xlane.f32.xlu1 %v3092_v16  ;;  %v1411_v47 = vmul.f32 %v3140_v62, %v3140_v62  ;;  %v1274_v26 = vpop.xlane.xlu1 %1273  ;;  %v1349_v58 = vsub.f32 %v3031_v61, %v1317_v50 }
 0x2a5   :  { %v1322_v24 = vmul.f32 0.03125, %v1274_v26 }
 0x2a6   :  { %1303 = vadd.xlane.f32.xlu0 %v3099_v57  ;;  %v3175_v61 = vsel %vm1371_vm0, %v1349_v58, 0.0 }
 0x2a7   :  { %v1354_v27 = vsub.f32 %v3041_v14, %v1322_v24  ;;  %v1414_v15 = vmul.f32 %v3175_v61, %v3175_v61 }
 0x2a8   :  { %1438 = vadd.xlane.f32.xlu1 %v1405_v19  ;;  %v1272_v19 = vpop.xlane.xlu0 %1271 }
 0x2a9   :  { %v1321_v0 = vmul.f32 0.03125, %v1272_v19  ;;  %v3196_v14 = vsel %vm1371_vm0, %v1354_v27, 0.0 }
 0x2aa   :  { %1436 = vadd.xlane.f32.xlu0 %v1404_v45  ;;  %v1278_v45 = vpop.xlane.xlu1 %1277  ;;  %v1419_v33 = vmul.f32 %v3196_v14, %v3196_v14 }
 0x2ab   :  { %v1324_v6 = vmul.f32 0.03125, %v1278_v45  ;;  %v1353_v21 = vsub.f32 %v3043_v18, %v1321_v0 }
 0x2ac   :  { %1442 = vadd.xlane.f32.xlu1 %v1407_v4  ;;  %v1276_v4 = vpop.xlane.xlu0 %1275 }
 0x2ad   :  { %v1323_v31 = vmul.f32 0.03125, %v1276_v4  ;;  %v1356_v12 = vsub.f32 %v3047_v25, %v1324_v6  ;;  %v3203_v18 = vsel %vm1371_vm0, %v1353_v21, 0.0 }
 0x2ae   :  { %1440 = vadd.xlane.f32.xlu0 %v1406_v8  ;;  %v1418_v41 = vmul.f32 %v3203_v18, %v3203_v18 }
 0x2af   :  { %v1355_v34 = vsub.f32 %v3049_v32, %v1323_v31 }
 0x2b0   :  { %1446 = vadd.xlane.f32.xlu1 %v1409_v28 }
 0x2b1   :  { %v3217_v55 = vsel %vm1371_vm0, %v1355_v34, 0.0 }
 0x2b2   :  { %1444 = vadd.xlane.f32.xlu0 %v1408_v42  ;;  %v1416_v42 = vmul.f32 %v3189_v5, %v3189_v5 }
 0x2b4   :  { %1450 = vadd.xlane.f32.xlu1 %v1411_v47  ;;  %v3210_v47 = vsel %vm1371_vm0, %v1356_v12, 0.0 }
 0x2b5   :  { %v1421_v26 = vmul.f32 %v3210_v47, %v3210_v47 }
 0x2b6   :  { %1448 = vadd.xlane.f32.xlu0 %v1410_v13 }
 0x2b8   :  { %1454 = vadd.xlane.f32.xlu1 %v1413_v43 }
 0x2ba   :  { %1452 = vadd.xlane.f32.xlu0 %v1412_v60 }
 0x2bb   :  { %v1282_v8 = vpop.xlane.xlu1 %1281 }
 0x2bc   :  { %1458 = vadd.xlane.f32.xlu1 %v1415_v23  ;;  %v1326_v36 = vmul.f32 0.03125, %v1282_v8 }
 0x2bd   :  { %v1280_v28 = vpop.xlane.xlu0 %1279 }
 0x2be   :  { %1456 = vadd.xlane.f32.xlu0 %v1414_v15  ;;  %v1325_v50 = vmul.f32 0.03125, %v1280_v28  ;;  %v1358_v25 = vsub.f32 %v3053_v39, %v1326_v36  ;;  %v1420_v39 = vmul.f32 %v3217_v55, %v3217_v55 }
 0x2c0   :  { %1462 = vadd.xlane.f32.xlu1 %v1417_v29  ;;  %v1357_v32 = vsub.f32 %v3055_v9, %v1325_v50  ;;  %v3224_v13 = vsel %vm1371_vm0, %v1358_v25, 0.0 }
 0x2c1   :  { %v1423_v9 = vmul.f32 %v3224_v13, %v3224_v13 }
 0x2c2   :  { %1460 = vadd.xlane.f32.xlu0 %v1416_v42  ;;  %v3230_v58 = vsel %vm1371_vm0, %v1357_v32, 0.0 }
 0x2c3   :  { %v1422_v44 = vmul.f32 %v3230_v58, %v3230_v58 }
 0x2c4   :  { %1466 = vadd.xlane.f32.xlu1 %v1419_v33 }
 0x2c6   :  { %1464 = vadd.xlane.f32.xlu0 %v1418_v41 }
 0x2c8   :  { %1470 = vadd.xlane.f32.xlu1 %v1421_v26 }
 0x2ca   :  { %1468 = vadd.xlane.f32.xlu0 %v1420_v39 }
 0x2cc   :  { %1474 = vadd.xlane.f32.xlu1 %v1423_v9 }
 0x2ce   :  { %v1286_v19 = vpop.xlane.xlu1 %1285  ;;  %1472 = vadd.xlane.f32.xlu0 %v1422_v44 }
 0x2cf   :  { %v1328_v43 = vmul.f32 0.03125, %v1286_v19 }
 0x2d0   :  { %v1284_v17 = vpop.xlane.xlu0 %1283 }
 0x2d1   :  { %v1360_v24 = vsub.f32 %v3059_v51, %v1328_v43  ;;  %v1327_v45 = vmul.f32 0.03125, %v1284_v17 }
 0x2d3   :  { %v3239_v60 = vsel %vm1371_vm0, %v1360_v24, 0.0  ;;  %v1359_v1 = vsub.f32 %v3061_v52, %v1327_v45 }
 0x2d4   :  { %v1425_v0 = vmul.f32 %v3239_v60, %v3239_v60 }
 0x2d5   :  { %v3246_v4 = vsel %vm1371_vm0, %v1359_v1, 0.0 }
 0x2d6   :  { %1478 = vadd.xlane.f32.xlu1 %v1425_v0  ;;  %v1424_v23 = vmul.f32 %v3246_v4, %v3246_v4 }
 0x2d8   :  { %1476 = vadd.xlane.f32.xlu0 %v1424_v23 }
 0x2e1   :  { %v1290_v51 = vpop.xlane.xlu1 %1289 }
 0x2e2   :  { %v1330_v27 = vmul.f32 0.03125, %v1290_v51 }
 0x2e3   :  { %v1288_v6 = vpop.xlane.xlu0 %1287 }
 0x2e4   :  { %v1362_v8 = vsub.f32 %v3065_v54, %v1330_v27  ;;  %v1329_v15 = vmul.f32 0.03125, %v1288_v6 }
 0x2e6   :  { %v3253_v52 = vsel %vm1371_vm0, %v1362_v8, 0.0  ;;  %v1361_v21 = vsub.f32 %v3067_v56, %v1329_v15 }
 0x2e7   :  { %v1427_v31 = vmul.f32 %v3253_v52, %v3253_v52 }
 0x2e8   :  { %v3260_v28 = vsel %vm1371_vm0, %v1361_v21, 0.0 }
 0x2e9   :  { %1482 = vadd.xlane.f32.xlu1 %v1427_v31  ;;  %v1426_v29 = vmul.f32 %v3260_v28, %v3260_v28 }
 0x2eb   :  { %1480 = vadd.xlane.f32.xlu0 %v1426_v29 }
 0x2f4   :  { %v1294_v54 = vpop.xlane.xlu1 %1293 }
 0x2f5   :  { %v1332_v12 = vmul.f32 0.03125, %v1294_v54 }
 0x2f6   :  { %v1292_v36 = vpop.xlane.xlu0 %1291 }
 0x2f7   :  { %v1364_v42 = vsub.f32 %v3071_v40, %v1332_v12  ;;  %v1331_v34 = vmul.f32 0.03125, %v1292_v36 }
 0x2f9   :  { %v3267_v56 = vsel %vm1371_vm0, %v1364_v42, 0.0  ;;  %v1363_v50 = vsub.f32 %v3073_v59, %v1331_v34 }
 0x2fa   :  { %v1429_v33 = vmul.f32 %v3267_v56, %v3267_v56 }
 0x2fb   :  { %v3274_v25 = vsel %vm1371_vm0, %v1363_v50, 0.0 }
 0x2fc   :  { %1486 = vadd.xlane.f32.xlu1 %v1429_v33  ;;  %v1428_v41 = vmul.f32 %v3274_v25, %v3274_v25 }
 0x2fe   :  { %1484 = vadd.xlane.f32.xlu0 %v1428_v41 }
 0x307   :  { %v1298_v40 = vpop.xlane.xlu1 %1297 }
 0x308   :  { %v1334_v32 = vmul.f32 0.03125, %v1298_v40 }
 0x309   :  { %v1296_v26 = vpop.xlane.xlu0 %1295 }
 0x30a   :  { %v1366_v39 = vsub.f32 %v3077_v63, %v1334_v32  ;;  %v1333_v9 = vmul.f32 0.03125, %v1296_v26 }
 0x30c   :  { %v3281_v59 = vsel %vm1371_vm0, %v1366_v39, 0.0  ;;  %v1365_v44 = vsub.f32 %v3079_v53, %v1333_v9 }
 0x30d   :  { %v1431_v19 = vmul.f32 %v3281_v59, %v3281_v59 }
 0x30e   :  { %v3288_v43 = vsel %vm1371_vm0, %v1365_v44, 0.0 }
 0x30f   :  { %1490 = vadd.xlane.f32.xlu1 %v1431_v19  ;;  %v1430_v17 = vmul.f32 %v3288_v43, %v3288_v43 }
 0x311   :  { %1488 = vadd.xlane.f32.xlu0 %v1430_v17 }
 0x31a   :  { %v1302_v63 = vpop.xlane.xlu1 %1301 }
 0x31b   :  { %v1336_v24 = vmul.f32 0.03125, %v1302_v63 }
 0x31c   :  { %v1300_v45 = vpop.xlane.xlu0 %1299 }
 0x31d   :  { %v1368_v1 = vsub.f32 %v3083_v48, %v1336_v24  ;;  %v1335_v0 = vmul.f32 0.03125, %v1300_v45 }
 0x31f   :  { %v3295_v53 = vsel %vm1371_vm0, %v1368_v1, 0.0  ;;  %v1367_v23 = vsub.f32 %v3085_v11, %v1335_v0 }
 0x320   :  { %v1433_v51 = vmul.f32 %v3295_v53, %v3295_v53 }
 0x321   :  { %v3302_v27 = vsel %vm1371_vm0, %v1367_v23, 0.0 }
 0x322   :  { %1494 = vadd.xlane.f32.xlu1 %v1433_v51  ;;  %v1432_v6 = vmul.f32 %v3302_v27, %v3302_v27 }
 0x324   :  { %1492 = vadd.xlane.f32.xlu0 %v1432_v6 }
 0x32d   :  { %v1306_v48 = vpop.xlane.xlu1 %1305 }
 0x32e   :  { %v1338_v8 = vmul.f32 0.03125, %v1306_v48 }
 0x32f   :  { %v1304_v15 = vpop.xlane.xlu0 %1303 }
 0x330   :  { %v1370_v21 = vsub.f32 %v3092_v16, %v1338_v8  ;;  %v1337_v31 = vmul.f32 0.03125, %v1304_v15 }
 0x331   :  { %v1439_v29 = vpop.xlane.xlu1 %1438 }
 0x332   :  { %v3309_v11 = vsel %vm1371_vm0, %v1370_v21, 0.0  ;;  %v1369_v54 = vsub.f32 %v3099_v57, %v1337_v31  ;;  %v1501_v12 = vmul.f32 0.03125, %v1439_v29  ;;  %v3323_v21 = vld [vmem:[%s3432_s3] ss:$0 sm:$0xff]  ;;  %s2288_s3 = smov [#allocation2]  }
 0x333   :  { %v1437_v36 = vpop.xlane.xlu0 %1436  ;;  %v1435_v42 = vmul.f32 %v3309_v11, %v3309_v11 }
 0x334   :  { %v3316_v34 = vsel %vm1371_vm0, %v1369_v54, 0.0  ;;  %v1533_v50 = vadd.f32 1e-12, %v1501_v12  ;;  %v1500_v33 = vmul.f32 0.03125, %v1437_v36 }
 0x335   :  { %1498 = vadd.xlane.f32.xlu1 %v1435_v42  ;;  %v1443_v16 = vpop.xlane.xlu1 %1442  ;;  %v1434_v41 = vmul.f32 %v3316_v34, %v3316_v34  ;;  %v3329_v42 = vld [vmem:[%s3433_s4] ss:$0 sm:$0xff]  ;;  %s1741_s4 = sshll.u32 %s2288_s3, 4  ;;  %s1742_s4 = int_to_ptr.vmem [resolvable:$true] %s1741_s4 }
 0x336   :  { %2197 = vrsqrt.f32 %v1533_v50  ;;  %v1532_v40 = vadd.f32 1e-12, %v1500_v33  ;;  %v1503_v32 = vmul.f32 0.03125, %v1443_v16  ;;  %s2261_s20 = scalar_lea.vmem %s1742_s4, 4096  ;;  %p2266_p1 = scmp.lt.s32.totalorder %s1742_s4, %s1742_s4 }
 0x337   :  { %1496 = vadd.xlane.f32.xlu0 %v1434_v41  ;;  %v1441_v57 = vpop.xlane.xlu0 %1440  ;;  %p2262_p0 = scmp.ne.s32.totalorder %s1742_s4, %s2261_s20  ;;  %p2267_p2 = scmp.lt.s32.totalorder %s2261_s20, %s2261_s20 }
 0x338   :  { %2199 = vrsqrt.f32 %v1532_v40  ;;  %v1535_v26 = vadd.f32 1e-12, %v1503_v32  ;;  %v1502_v39 = vmul.f32 0.03125, %v1441_v57 }
 0x339   :  { %v1447_v9 = vpop.xlane.xlu1 %1446  ;;  %p2268_p3 = por %p2267_p2, %p2266_p1 }
 0x33a   :  { %2201 = vrsqrt.f32 %v1535_v26  ;;  %v1534_v3 = vadd.f32 1e-12, %v1502_v39  ;;  %v1505_v44 = vmul.f32 0.03125, %v1447_v9 }
 0x33b   :  { %v1445_v19 = vpop.xlane.xlu0 %1444  ;;  %p2269_p4 = pnand %p2268_p3, %p2262_p0 }
 0x33c   :  { %2203 = vrsqrt.f32 %v1534_v3  ;;  %v1537_v17 = vadd.f32 1e-12, %v1505_v44  ;;  %v1504_v63 = vmul.f32 0.03125, %v1445_v19 }
 0x33d   :  { %v1451_v24 = vpop.xlane.xlu1 %1450 }
 0x33e   :  { %2205 = vrsqrt.f32 %v1537_v17  ;;  %v1536_v45 = vadd.f32 1e-12, %v1504_v63  ;;  %v1507_v1 = vmul.f32 0.03125, %v1451_v24 }
 0x33f   :  { %v1449_v0 = vpop.xlane.xlu0 %1448 }
 0x340   :  { %2207 = vrsqrt.f32 %v1536_v45  ;;  %v1539_v23 = vadd.f32 1e-12, %v1507_v1  ;;  %v1506_v51 = vmul.f32 0.03125, %v1449_v0 }
 0x341   :  { %v1455_v6 = vpop.xlane.xlu1 %1454 }
 0x342   :  { %2209 = vrsqrt.f32 %v1539_v23  ;;  %v1538_v48 = vadd.f32 1e-12, %v1506_v51  ;;  %v1509_v8 = vmul.f32 0.03125, %v1455_v6 }
 0x343   :  { %v2198_v15 = vpop.eup %2197  ;;  %v1453_v31 = vpop.xlane.xlu0 %1452 }
 0x344   :  { %v1597_v29 = vmul.f32 %v2198_v15, %v3096_v20  ;;  %2211 = vrsqrt.f32 %v1538_v48  ;;  %v1541_v54 = vadd.f32 1e-12, %v1509_v8  ;;  %v1508_v12 = vmul.f32 0.03125, %v1453_v31 }
 0x345   :  { %v2200_v36 = vpop.eup %2199  ;;  %v1459_v50 = vpop.xlane.xlu1 %1458 }
 0x346   :  { %v1635_v33 = vmul.f32 %v3323_v21, %v1597_v29  ;;  %v1596_v16 = vmul.f32 %v2200_v36, %v3104_v22  ;;  %2213 = vrsqrt.f32 %v1541_v54  ;;  %v1540_v41 = vadd.f32 1e-12, %v1508_v12 }
 0x347   :  { %v2202_v40 = vpop.eup %2201  ;;  %v1511_v32 = vmul.f32 0.03125, %v1459_v50  ;;  %v1457_v57 = vpop.xlane.xlu0 %1456 }
 0x348   :  { %v1673_v20 = vadd.f32 %v3329_v42, %v1635_v33  ;;  %v1634_v26 = vmul.f32 %v3323_v21, %v1596_v16  ;;  %v1599_v39 = vmul.f32 %v2202_v40, %v3112_v35  ;;  %2215 = vrsqrt.f32 %v1540_v41 }
 0x349   :  { %v2204_v9 = vpop.eup %2203  ;;  %v1543_v3 = vadd.f32 1e-12, %v1511_v32  ;;  %v1510_v44 = vmul.f32 0.03125, %v1457_v57  ;;  %v1463_v19 = vpop.xlane.xlu1 %1462 }
 0x34a   :  { %1705 = vst [vmem:[#allocation2 + $0x8] sm:$0xff] %v1673_v20  ;;  %v1672_v17 = vadd.f32 %v3329_v42, %v1634_v26  ;;  %v1637_v22 = vmul.f32 %v3323_v21, %v1599_v39  ;;  %v1598_v63 = vmul.f32 %v2204_v9, %v3119_v30  ;;  %v1513_v24 = vmul.f32 0.03125, %v1463_v19 }
 0x34b   :  { %v2206_v45 = vpop.eup %2205  ;;  %2217 = vrsqrt.f32 %v1543_v3  ;;  %v1542_v1 = vadd.f32 1e-12, %v1510_v44  ;;  %v1461_v0 = vpop.xlane.xlu0 %1460 }
 0x34c   :  { %1704 = vst [vmem:[#allocation2] sm:$0xff] %v1672_v17  ;;  %v1675_v35 = vadd.f32 %v3329_v42, %v1637_v22  ;;  %v1636_v23 = vmul.f32 %v3323_v21, %v1598_v63  ;;  %v1601_v51 = vmul.f32 %v2206_v45, %v3126_v38  ;;  %v1545_v6 = vadd.f32 1e-12, %v1513_v24 }
 0x34d   :  { %v2208_v48 = vpop.eup %2207  ;;  %2219 = vrsqrt.f32 %v1542_v1  ;;  %v1512_v8 = vmul.f32 0.03125, %v1461_v0  ;;  %v1467_v15 = vpop.xlane.xlu1 %1466 }
 0x34e   :  { %1707 = vst [vmem:[#allocation2 + $0x18] sm:$0xff] %v1675_v35  ;;  %v1674_v30 = vadd.f32 %v3329_v42, %v1636_v23  ;;  %v1639_v31 = vmul.f32 %v3323_v21, %v1601_v51  ;;  %v1600_v29 = vmul.f32 %v2208_v48, %v3133_v37  ;;  %2221 = vrsqrt.f32 %v1545_v6 }
 0x34f   :  { %v2210_v54 = vpop.eup %2209  ;;  %v1544_v12 = vadd.f32 1e-12, %v1512_v8  ;;  %v1515_v36 = vmul.f32 0.03125, %v1467_v15  ;;  %v1465_v50 = vpop.xlane.xlu0 %1464 }
 0x350   :  { %1706 = vst [vmem:[#allocation2 + $0x10] sm:$0xff] %v1674_v30  ;;  %v1677_v38 = vadd.f32 %v3329_v42, %v1639_v31  ;;  %v1638_v33 = vmul.f32 %v3323_v21, %v1600_v29  ;;  %v1603_v16 = vmul.f32 %v2210_v54, %v3140_v62  ;;  %v1514_v41 = vmul.f32 0.03125, %v1465_v50 }
 0x351   :  { %v2212_v40 = vpop.eup %2211  ;;  %2223 = vrsqrt.f32 %v1544_v12  ;;  %v1547_v32 = vadd.f32 1e-12, %v1515_v36  ;;  %v1471_v57 = vpop.xlane.xlu1 %1470 }
 0x352   :  { %1709 = vst [vmem:[#allocation2 + $0x28] sm:$0xff] %v1677_v38  ;;  %v1676_v37 = vadd.f32 %v3329_v42, %v1638_v33  ;;  %v1641_v20 = vmul.f32 %v3323_v21, %v1603_v16  ;;  %v1602_v26 = vmul.f32 %v2212_v40, %v3147_v46  ;;  %v1546_v39 = vadd.f32 1e-12, %v1514_v41 }
 0x353   :  { %v2214_v9 = vpop.eup %2213  ;;  %2225 = vrsqrt.f32 %v1547_v32  ;;  %v1517_v3 = vmul.f32 0.03125, %v1471_v57  ;;  %v1469_v44 = vpop.xlane.xlu0 %1468 }
 0x354   :  { %1708 = vst [vmem:[#allocation2 + $0x20] sm:$0xff] %v1676_v37  ;;  %v1679_v62 = vadd.f32 %v3329_v42, %v1641_v20  ;;  %v1640_v19 = vmul.f32 %v3323_v21, %v1602_v26  ;;  %v1605_v17 = vmul.f32 %v2214_v9, %v3154_v2  ;;  %2227 = vrsqrt.f32 %v1546_v39 }
 0x355   :  { %v2216_v22 = vpop.eup %2215  ;;  %v1549_v63 = vadd.f32 1e-12, %v1517_v3  ;;  %v1516_v24 = vmul.f32 0.03125, %v1469_v44  ;;  %v1475_v45 = vpop.xlane.xlu1 %1474 }
 0x356   :  { %1711 = vst [vmem:[#allocation2 + $0x38] sm:$0xff] %v1679_v62  ;;  %v1678_v46 = vadd.f32 %v3329_v42, %v1640_v19  ;;  %v1643_v1 = vmul.f32 %v3323_v21, %v1605_v17  ;;  %v1604_v0 = vmul.f32 %v2216_v22, %v3161_v49  ;;  %v1519_v35 = vmul.f32 0.03125, %v1475_v45 }
 0x357   :  { %2229 = vrsqrt.f32 %v1549_v63  ;;  %v1548_v23 = vadd.f32 1e-12, %v1516_v24  ;;  %v1473_v51 = vpop.xlane.xlu0 %1472 }
 0x358   :  { %v2218_v6 = vpop.eup %2217  ;;  %1710 = vst [vmem:[#allocation2 + $0x30] sm:$0xff] %v1678_v46  ;;  %v1681_v2 = vadd.f32 %v3329_v42, %v1643_v1  ;;  %v1642_v48 = vmul.f32 %v3323_v21, %v1604_v0  ;;  %v1551_v8 = vadd.f32 1e-12, %v1519_v35  ;;  %v1518_v15 = vmul.f32 0.03125, %v1473_v51 }
 0x359   :  { %v1607_v30 = vmul.f32 %v2218_v6, %v3168_v7  ;;  %2231 = vrsqrt.f32 %v1548_v23 }
 0x35a   :  { %v2220_v31 = vpop.eup %2219  ;;  %1713 = vst [vmem:[#allocation2 + $0x48] sm:$0xff] %v1681_v2  ;;  %v1680_v29 = vadd.f32 %v3329_v42, %v1642_v48  ;;  %2233 = vrsqrt.f32 %v1551_v8  ;;  %v1550_v49 = vadd.f32 1e-12, %v1518_v15 }
 0x35b   :  { %v2222_v54 = vpop.eup %2221  ;;  %v1645_v12 = vmul.f32 %v3323_v21, %v1607_v30  ;;  %v1606_v36 = vmul.f32 %v2220_v31, %v3175_v61 }
 0x35c   :  { %1712 = vst [vmem:[#allocation2 + $0x40] sm:$0xff] %v1680_v29  ;;  %v1609_v50 = vmul.f32 %v2222_v54, %v3182_v10  ;;  %2235 = vrsqrt.f32 %v1550_v49 }
 0x35d   :  { %v1683_v38 = vadd.f32 %v3329_v42, %v1645_v12  ;;  %v1644_v7 = vmul.f32 %v3323_v21, %v1606_v36 }
 0x35e   :  { %v2224_v33 = vpop.eup %2223  ;;  %v1647_v16 = vmul.f32 %v3323_v21, %v1609_v50 }
 0x35f   :  { %1715 = vst [vmem:[#allocation2 + $0x58] sm:$0xff] %v1683_v38  ;;  %v1682_v41 = vadd.f32 %v3329_v42, %v1644_v7  ;;  %v1608_v40 = vmul.f32 %v2224_v33, %v3189_v5  ;;  %v1479_v32 = vpop.xlane.xlu1 %1478 }
 0x360   :  { %v2226_v57 = vpop.eup %2225  ;;  %v1685_v61 = vadd.f32 %v3329_v42, %v1647_v16  ;;  %v1521_v37 = vmul.f32 0.03125, %v1479_v32 }
 0x361   :  { %v2228_v20 = vpop.eup %2227  ;;  %1714 = vst [vmem:[#allocation2 + $0x50] sm:$0xff] %v1682_v41  ;;  %v1646_v10 = vmul.f32 %v3323_v21, %v1608_v40  ;;  %v1611_v26 = vmul.f32 %v2226_v57, %v3196_v14  ;;  %v1477_v39 = vpop.xlane.xlu0 %1476 }
 0x362   :  { %1717 = vst [vmem:[#allocation2 + $0x68] sm:$0xff] %v1685_v61  ;;  %v1610_v9 = vmul.f32 %v2228_v20, %v3203_v18  ;;  %v1553_v3 = vadd.f32 1e-12, %v1521_v37  ;;  %v1520_v44 = vmul.f32 0.03125, %v1477_v39 }
 0x363   :  { %v1684_v62 = vadd.f32 %v3329_v42, %v1646_v10  ;;  %v1649_v5 = vmul.f32 %v3323_v21, %v1611_v26 }
 0x364   :  { %v2230_v19 = vpop.eup %2229  ;;  %v1648_v17 = vmul.f32 %v3323_v21, %v1610_v9  ;;  %2237 = vrsqrt.f32 %v1553_v3  ;;  %v1552_v22 = vadd.f32 1e-12, %v1520_v44 }
 0x365   :  { %1716 = vst [vmem:[#allocation2 + $0x60] sm:$0xff] %v1684_v62  ;;  %v1687_v63 = vadd.f32 %v3329_v42, %v1649_v5  ;;  %v1613_v14 = vmul.f32 %v2230_v19, %v3210_v47 }
 0x366   :  { %v2232_v24 = vpop.eup %2231  ;;  %v1686_v45 = vadd.f32 %v3329_v42, %v1648_v17  ;;  %2239 = vrsqrt.f32 %v1552_v22 }
 0x367   :  { %v2234_v18 = vpop.eup %2233  ;;  %1719 = vst [vmem:[#allocation2 + $0x78] sm:$0xff] %v1687_v63  ;;  %v1651_v46 = vmul.f32 %v3323_v21, %v1613_v14  ;;  %v1612_v1 = vmul.f32 %v2232_v24, %v3217_v55 }
 0x368   :  { %1718 = vst [vmem:[#allocation2 + $0x70] sm:$0xff] %v1686_v45  ;;  %v1615_v0 = vmul.f32 %v2234_v18, %v3224_v13 }
 0x369   :  { %v2236_v35 = vpop.eup %2235  ;;  %v1689_v23 = vadd.f32 %v3329_v42, %v1651_v46  ;;  %v1650_v51 = vmul.f32 %v3323_v21, %v1612_v1 }
 0x36a   :  { %v1653_v47 = vmul.f32 %v3323_v21, %v1615_v0  ;;  %v1614_v6 = vmul.f32 %v2236_v35, %v3230_v58 }
 0x36b   :  { %1721 = vst [vmem:[#allocation2 + $0x88] sm:$0xff] %v1689_v23  ;;  %v1688_v2 = vadd.f32 %v3329_v42, %v1650_v51 }
 0x36c   :  { %v1691_v48 = vadd.f32 %v3329_v42, %v1653_v47  ;;  %v1652_v8 = vmul.f32 %v3323_v21, %v1614_v6 }
 0x36d   :  { %1720 = vst [vmem:[#allocation2 + $0x80] sm:$0xff] %v1688_v2 }
 0x36e   :  { %1723 = vst [vmem:[#allocation2 + $0x98] sm:$0xff] %v1691_v48  ;;  %v1690_v55 = vadd.f32 %v3329_v42, %v1652_v8 }
 0x370   :  { %1722 = vst [vmem:[#allocation2 + $0x90] sm:$0xff] %v1690_v55 }
 0x371   :  { %v2238_v13 = vpop.eup %2237 }
 0x372   :  { %v1617_v15 = vmul.f32 %v2238_v13, %v3239_v60  ;;  %v1483_v30 = vpop.xlane.xlu1 %1482 }
 0x373   :  { %v2240_v31 = vpop.eup %2239  ;;  %v1523_v29 = vmul.f32 0.03125, %v1483_v30 }
 0x374   :  { %v1655_v58 = vmul.f32 %v3323_v21, %v1617_v15  ;;  %v1616_v49 = vmul.f32 %v2240_v31, %v3246_v4  ;;  %v1481_v54 = vpop.xlane.xlu0 %1480 }
 0x375   :  { %v1555_v12 = vadd.f32 1e-12, %v1523_v29  ;;  %v1522_v36 = vmul.f32 0.03125, %v1481_v54 }
 0x376   :  { %v1693_v50 = vadd.f32 %v3329_v42, %v1655_v58  ;;  %v1654_v38 = vmul.f32 %v3323_v21, %v1616_v49 }
 0x377   :  { %2241 = vrsqrt.f32 %v1555_v12  ;;  %v1554_v7 = vadd.f32 1e-12, %v1522_v36 }
 0x378   :  { %1725 = vst [vmem:[#allocation2 + $0xa8] sm:$0xff] %v1693_v50  ;;  %v1692_v33 = vadd.f32 %v3329_v42, %v1654_v38 }
 0x379   :  { %2243 = vrsqrt.f32 %v1554_v7 }
 0x37a   :  { %1724 = vst [vmem:[#allocation2 + $0xa0] sm:$0xff] %v1692_v33 }
 0x384   :  { %v2242_v60 = vpop.eup %2241 }
 0x385   :  { %v1619_v16 = vmul.f32 %v2242_v60, %v3253_v52  ;;  %v1487_v41 = vpop.xlane.xlu1 %1486 }
 0x386   :  { %v2244_v40 = vpop.eup %2243  ;;  %v1525_v4 = vmul.f32 0.03125, %v1487_v41 }
 0x387   :  { %v1657_v32 = vmul.f32 %v3323_v21, %v1619_v16  ;;  %v1618_v57 = vmul.f32 %v2244_v40, %v3260_v28  ;;  %v1485_v61 = vpop.xlane.xlu0 %1484 }
 0x388   :  { %v1557_v37 = vadd.f32 1e-12, %v1525_v4  ;;  %v1524_v20 = vmul.f32 0.03125, %v1485_v61 }
 0x389   :  { %v1695_v10 = vadd.f32 %v3329_v42, %v1657_v32  ;;  %v1656_v26 = vmul.f32 %v3323_v21, %v1618_v57 }
 0x38a   :  { %2245 = vrsqrt.f32 %v1557_v37  ;;  %v1556_v39 = vadd.f32 1e-12, %v1524_v20 }
 0x38b   :  { %1727 = vst [vmem:[#allocation2 + $0xb8] sm:$0xff] %v1695_v10  ;;  %v1694_v9 = vadd.f32 %v3329_v42, %v1656_v26 }
 0x38c   :  { %2247 = vrsqrt.f32 %v1556_v39 }
 0x38d   :  { %1726 = vst [vmem:[#allocation2 + $0xb0] sm:$0xff] %v1694_v9 }
 0x397   :  { %v2246_v52 = vpop.eup %2245 }
 0x398   :  { %v1621_v3 = vmul.f32 %v2246_v52, %v3267_v56  ;;  %v1491_v44 = vpop.xlane.xlu1 %1490 }
 0x399   :  { %v2248_v62 = vpop.eup %2247  ;;  %v1527_v28 = vmul.f32 0.03125, %v1491_v44 }
 0x39a   :  { %v1659_v5 = vmul.f32 %v3323_v21, %v1621_v3  ;;  %v1620_v19 = vmul.f32 %v2248_v62, %v3274_v25  ;;  %v1489_v17 = vpop.xlane.xlu0 %1488 }
 0x39b   :  { %v1559_v22 = vadd.f32 1e-12, %v1527_v28  ;;  %v1526_v63 = vmul.f32 0.03125, %v1489_v17 }
 0x39c   :  { %v1697_v14 = vadd.f32 %v3329_v42, %v1659_v5  ;;  %v1658_v24 = vmul.f32 %v3323_v21, %v1620_v19 }
 0x39d   :  { %2249 = vrsqrt.f32 %v1559_v22  ;;  %v1558_v45 = vadd.f32 1e-12, %v1526_v63 }
 0x39e   :  { %1729 = vst [vmem:[#allocation2 + $0xc8] sm:$0xff] %v1697_v14  ;;  %v1696_v18 = vadd.f32 %v3329_v42, %v1658_v24 }
 0x39f   :  { %2251 = vrsqrt.f32 %v1558_v45 }
 0x3a0   :  { %1728 = vst [vmem:[#allocation2 + $0xc0] sm:$0xff] %v1696_v18 }
 0x3aa   :  { %v2250_v56 = vpop.eup %2249 }
 0x3ab   :  { %v1623_v46 = vmul.f32 %v2250_v56, %v3281_v59  ;;  %v1495_v1 = vpop.xlane.xlu1 %1494 }
 0x3ac   :  { %v2252_v0 = vpop.eup %2251  ;;  %v1529_v25 = vmul.f32 0.03125, %v1495_v1 }
 0x3ad   :  { %v1661_v35 = vmul.f32 %v3323_v21, %v1623_v46  ;;  %v1622_v23 = vmul.f32 %v2252_v0, %v3288_v43  ;;  %v1493_v51 = vpop.xlane.xlu0 %1492 }
 0x3ae   :  { %v1561_v47 = vadd.f32 1e-12, %v1529_v25  ;;  %v1528_v6 = vmul.f32 0.03125, %v1493_v51 }
 0x3af   :  { %v1699_v2 = vadd.f32 %v3329_v42, %v1661_v35  ;;  %v1660_v48 = vmul.f32 %v3323_v21, %v1622_v23 }
 0x3b0   :  { %2253 = vrsqrt.f32 %v1561_v47  ;;  %v1560_v8 = vadd.f32 1e-12, %v1528_v6 }
 0x3b1   :  { %1731 = vst [vmem:[#allocation2 + $0xd8] sm:$0xff] %v1699_v2  ;;  %v1698_v55 = vadd.f32 %v3329_v42, %v1660_v48 }
 0x3b2   :  { %2255 = vrsqrt.f32 %v1560_v8 }
 0x3b3   :  { %1730 = vst [vmem:[#allocation2 + $0xd0] sm:$0xff] %v1698_v55 }
 0x3bd   :  { %v2254_v59 = vpop.eup %2253 }
 0x3be   :  { %v1625_v13 = vmul.f32 %v2254_v59, %v3295_v53  ;;  %v1499_v15 = vpop.xlane.xlu1 %1498 }
 0x3bf   :  { %v2256_v30 = vpop.eup %2255  ;;  %v1531_v43 = vmul.f32 0.03125, %v1499_v15 }
 0x3c0   :  { %v1663_v31 = vmul.f32 %v3323_v21, %v1625_v13  ;;  %v1624_v29 = vmul.f32 %v2256_v30, %v3302_v27  ;;  %v1497_v58 = vpop.xlane.xlu0 %1496 }
 0x3c1   :  { %v1563_v49 = vadd.f32 1e-12, %v1531_v43  ;;  %v1530_v54 = vmul.f32 0.03125, %v1497_v58 }
 0x3c2   :  { %v1701_v12 = vadd.f32 %v3329_v42, %v1663_v31  ;;  %v1662_v36 = vmul.f32 %v3323_v21, %v1624_v29 }
 0x3c3   :  { %2257 = vrsqrt.f32 %v1563_v49  ;;  %v1562_v50 = vadd.f32 1e-12, %v1530_v54 }
 0x3c4   :  { %1733 = vst [vmem:[#allocation2 + $0xe8] sm:$0xff] %v1701_v12  ;;  %v1700_v38 = vadd.f32 %v3329_v42, %v1662_v36 }
 0x3c5   :  { %2259 = vrsqrt.f32 %v1562_v50 }
 0x3c6   :  { %1732 = vst [vmem:[#allocation2 + $0xe0] sm:$0xff] %v1700_v38 }
 0x3d0   :  { %v2258_v53 = vpop.eup %2257 }
 0x3d1   :  { %v1627_v7 = vmul.f32 %v2258_v53, %v3309_v11 }
 0x3d2   :  { %v2260_v33 = vpop.eup %2259 }
 0x3d3   :  { %v1665_v27 = vmul.f32 %v3323_v21, %v1627_v7  ;;  %v1626_v60 = vmul.f32 %v2260_v33, %v3316_v34 }
 0x3d5   :  { %v1703_v16 = vadd.f32 %v3329_v42, %v1665_v27  ;;  %v1664_v41 = vmul.f32 %v3323_v21, %v1626_v60 }
 0x3d7   :  { %1735 = vst [vmem:[#allocation2 + $0xf8] sm:$0xff] %v1703_v16  ;;  %v1702_v40 = vadd.f32 %v3329_v42, %v1664_v41 }
 0x3d9   :  { %1734 = vst [vmem:[#allocation2 + $0xf0] sm:$0xff] %v1702_v40 }
 0x3da   :  { %2272 = shalt.err (!%p2269_p4)
}
 0x3db   :  { %s2289_s21 = smov 128   ;;  %s2290_s22 = smov 8  }
 0x3dc   :  { %1747 = dma.vmem_to_hbm [thread:$0]  %s1742_s4, 4096, %s3434_s5, [#allocation3], %s2289_s21, %s2289_s21, %s2290_s22  }
 0x3dd   :  { %2281 = dma.done.wait [#allocation3], 4096  }
 0x3de   :  { %2282 = vsyncadd [#allocation3], 4294963200 }
 0x3df   :  { %1751 = vsyncpa [#allocation3], 1 }

</bundles_post_ra>
